<compile_context>
chip_gen: v7x
topology: tpu7x:2x2x1
jax: 0.10.0
libtpu: 0.0.40
codegen_flags: <defaults>
</compile_context>

<pallas_src>
import functools

import jax
import jax.numpy as jnp
from jax.experimental import pallas as pl
from jax.experimental.pallas import tpu as pltpu


def _round_up(x, m):
    return ((x + m - 1) // m) * m


def _box_head_kernel(feat_ref, w_ref, b_ref, out_ref, *, inv_hw):
    """feat_ref: (TILE_N, C, HW) — native NCHW layout, HW on lanes.
    w_ref: (C, P) fused [Wc|Wr|We|0] weights; b_ref: (1, P); out_ref: (TILE_N, P).
    """
    # Spatial mean over the last (lane) axis -> (TILE_N, C) with C on lanes.
    # The cross-lane reduce runs in the XLU slot and hides under the HBM DMA
    # stream; accumulation is in f32 regardless of the feat dtype.
    fv = jnp.sum(feat_ref[...].astype(jnp.float32), axis=-1) * inv_hw
    out_ref[...] = (
        jnp.dot(fv, w_ref[...], preferred_element_type=jnp.float32) + b_ref[...]
    )


def _pick_tiling(N, HW, C, P, feat_itemsize):
    """Pick TILE_N and a VMEM limit from detected capacity, budgeting for the
    feat, weight, bias and output double buffers (with lane/sublane padding)."""
    try:
        vmem_cap = int(pltpu.get_tpu_info().vmem_capacity_bytes)
    except Exception:
        vmem_cap = 64 * 1024 * 1024  # conservative: v7x per-TensorCore size
    vmem_limit = min(int(vmem_cap * 0.75), 100 * 1024 * 1024)
    budget = int(vmem_limit * 0.9)

    # VMEM tile footprints: last dim pads to a multiple of 128 lanes,
    # second-last to a multiple of 8 sublanes.
    hw_pad = _round_up(HW, 128)
    c_sub = _round_up(C, 8)
    fixed = 2 * c_sub * P * 4 + 2 * 8 * P * 4            # weight + bias double buffers
    per_row = c_sub * hw_pad * feat_itemsize + P * 4     # feat row + output row

    tile_n = 512  # 512-row tiles ≈85% of HBM roofline; larger buys ~1% (not worth it)
    while tile_n > 8 and fixed + 2 * tile_n * per_row > budget:
        tile_n //= 2
    tile_n = max(8, min(tile_n, _round_up(N, 8)))
    return tile_n, vmem_limit


@functools.partial(jax.jit, static_argnames=("num_classes",))
def box_predictor(feat_map, wc, bc, wr, gamma, beta, we, be, *, num_classes):
    """feat_map: (N, C, H, W) NCHW (PyTorch convention). f32 or bf16.

    wc: (num_classes, C), bc: (num_classes,)
    wr: (4, C),           gamma, beta: (4,)
    we: (1, C),           be: (1,)
    Returns (cls (N, num_classes), reg (N, 4), qual (N, 1)).
    """
    N, C, H, W = feat_map.shape
    HW = H * W

    # Free, contiguous reshape of NCHW (no transpose, no extra HBM pass).
    feat = feat_map.reshape(N, C, HW)

    # Fuse [classifier | regressor.fc | evaluator] into one (C, P) weight with
    # the output dim padded to a lane-dense multiple of 128 (unmasked stores).
    n_out = num_classes + 4 + 1
    P = _round_up(n_out, 128)
    w_all = jnp.concatenate([wc, wr, we], axis=0).T.astype(jnp.float32)   # (C, n_out)
    w_all = jnp.pad(w_all, ((0, 0), (0, P - n_out)))
    b_all = jnp.concatenate(
        [bc.reshape(-1), jnp.zeros((4,), jnp.float32), be.reshape(-1)]
    ).astype(jnp.float32)
    b_all = jnp.pad(b_all, (0, P - n_out)).reshape(1, P)

    tile_n, vmem_limit = _pick_tiling(N, HW, C, P, feat.dtype.itemsize)
    grid_n = pl.cdiv(N, tile_n)  # ragged final block: OOB stores are masked

    cost = pl.CostEstimate(
        flops=int(N * C * HW + 2 * N * C * P),
        transcendentals=0,
        bytes_accessed=int(
            N * C * HW * feat.dtype.itemsize + C * P * 4 + N * P * 4
        ),
    )

    kernel = functools.partial(_box_head_kernel, inv_hw=1.0 / HW)
    slab = pl.pallas_call(
        kernel,
        out_shape=jax.ShapeDtypeStruct((N, P), jnp.float32),
        grid=(grid_n,),
        in_specs=[
            pl.BlockSpec((tile_n, C, HW), lambda i: (i, 0, 0)),  # feat tiles (pipelined)
            pl.BlockSpec((C, P), lambda i: (0, 0)),              # fused weights (resident)
            pl.BlockSpec((1, P), lambda i: (0, 0)),              # fused bias
        ],
        out_specs=pl.BlockSpec((tile_n, P), lambda i: (i, 0)),
        compiler_params=pltpu.CompilerParams(
            dimension_semantics=("parallel",),   # independent tiles -> megacore OK
            vmem_limit_bytes=vmem_limit,
        ),
        cost_estimate=cost,
    )(feat, w_all, b_all)

    cls = slab[:, :num_classes]
    reg_lin = slab[:, num_classes:num_classes + 4]
    qual = slab[:, num_classes + 4:num_classes + 5]

    # BatchNorm1d(4) with training-mode batch statistics over the FULL batch
    # (biased variance, eps=1e-5).  Only 16*N bytes — plain XLA is cheaper
    # than a dedicated kernel launch here.
    mu = jnp.mean(reg_lin, axis=0, keepdims=True)
    var = jnp.mean((reg_lin - mu) ** 2, axis=0, keepdims=True)
    reg = (reg_lin - mu) * jax.lax.rsqrt(var + 1e-5) * gamma + beta

    return cls, reg, qual


def _xavier_uniform(key, out_features, in_features):
    # matches torch.nn.init.xavier_uniform_ for a (out, in) weight
    limit = (6.0 / (in_features + out_features)) ** 0.5
    return jax.random.uniform(
        key, (out_features, in_features), jnp.float32, minval=-limit, maxval=limit
    )


if __name__ == "__main__":
    # Small shapes consistent with the module's forward (NCHW feature map).
    N, C, H, W = 8, 128, 8, 8
    num_classes = 16

    key = jax.random.PRNGKey(0)
    k_feat, k_wc, k_wr, k_we = jax.random.split(key, 4)

    feat_map = jax.random.normal(k_feat, (N, C, H, W), jnp.float32)

    # Deterministic parameter init (reset_parameters semantics).
    Wc = _xavier_uniform(k_wc, num_classes, C)      # classifier.weight (num_classes, C)
    bc = jnp.zeros((num_classes,), jnp.float32)     # classifier.bias
    Wr = _xavier_uniform(k_wr, 4, C)                # regressor.fc.weight (4, C), no bias
    gamma = jnp.ones((4,), jnp.float32)             # BatchNorm1d weight
    beta = jnp.zeros((4,), jnp.float32)             # BatchNorm1d bias
    We = _xavier_uniform(k_we, 1, C)                # evaluator.weight (1, C)
    be = jnp.zeros((1,), jnp.float32)               # evaluator.bias

    cls_out, reg_out, qual_out = box_predictor(
        feat_map, Wc, bc, Wr, gamma, beta, We, be, num_classes=num_classes
    )
    jax.block_until_ready((cls_out, reg_out, qual_out))

    # Pure-JAX reference check.
    fv = jnp.mean(feat_map, axis=(2, 3))
    ref_cls = fv @ Wc.T + bc
    reg_lin = fv @ Wr.T
    mu = jnp.mean(reg_lin, axis=0, keepdims=True)
    var = jnp.mean((reg_lin - mu) ** 2, axis=0, keepdims=True)
    ref_reg = (reg_lin - mu) * jax.lax.rsqrt(var + 1e-5) * gamma + beta
    ref_qual = fv @ We.T + be

    assert jnp.allclose(cls_out, ref_cls, atol=1e-4, rtol=1e-4)
    assert jnp.allclose(reg_out, ref_reg, atol=1e-4, rtol=1e-4)
    assert jnp.allclose(qual_out, ref_qual, atol=1e-4, rtol=1e-4)

    print("KERNEL_OK")
</pallas_src>

<mosaic_0001>
module attributes {stable_mosaic.version = 11 : i64} {
  func.func @_box_head_kernel(%arg0: i32, %arg1: memref<8x128x64xf32, #tpu.memory_space<vmem>>, %arg2: memref<128x128xf32, #tpu.memory_space<vmem>>, %arg3: memref<1x128xf32, #tpu.memory_space<vmem>>, %arg4: memref<8x128xf32, #tpu.memory_space<vmem>>) attributes {dimension_semantics = [#tpu.dimension_semantics<parallel>], iteration_bounds = array<i64: 1>, scalar_prefetch = 0 : i64, scratch_operands = 0 : i64, tpu.core_type = #tpu.core_type<tc>, window_params = [{transform_indices = @transform_0, window_bounds = array<i64: 8, 128, 64>}, {pipeline_mode = #tpu.pipeline_mode<synchronous>, transform_indices = @transform_1, window_bounds = array<i64: 128, 128>}, {pipeline_mode = #tpu.pipeline_mode<synchronous>, transform_indices = @transform_2, window_bounds = array<i64: 1, 128>}, {transform_indices = @transform_3, window_bounds = array<i64: 8, 128>}]} {
    %c0 = arith.constant 0 : index
    %c0_0 = arith.constant 0 : index
    %c0_1 = arith.constant 0 : index
    %0 = vector.load %arg1[%c0, %c0_0, %c0_1] : memref<8x128x64xf32, #tpu.memory_space<vmem>>, vector<8x128x64xf32>
    %cst = arith.constant dense<0.000000e+00> : vector<8x128xf32>
    %1 = vector.multi_reduction <add>, %0, %cst [2] : vector<8x128x64xf32> to vector<8x128xf32>
    %cst_2 = arith.constant 1.562500e-02 : f32
    %2 = vector.broadcast %cst_2 : f32 to vector<8x128xf32>
    %3 = arith.mulf %1, %2 : vector<8x128xf32>
    %c0_3 = arith.constant 0 : index
    %c0_4 = arith.constant 0 : index
    %4 = vector.load %arg2[%c0_3, %c0_4] : memref<128x128xf32, #tpu.memory_space<vmem>>, vector<128x128xf32>
    %cst_5 = arith.constant dense<0.000000e+00> : vector<8x128xf32>
    %5 = tpu.matmul %3, %4, %cst_5 {dimension_numbers = #tpu.dot_dimension_numbers<[1], [0], [0], [1], [0, 0, 1, 1], [], []>} : vector<8x128xf32>, vector<128x128xf32>, vector<8x128xf32> -> vector<8x128xf32>
    %c0_6 = arith.constant 0 : index
    %c0_7 = arith.constant 0 : index
    %6 = vector.load %arg3[%c0_6, %c0_7] : memref<1x128xf32, #tpu.memory_space<vmem>>, vector<1x128xf32>
    %7 = vector.broadcast %6 : vector<1x128xf32> to vector<8x128xf32>
    %8 = arith.addf %5, %7 : vector<8x128xf32>
    %c0_8 = arith.constant 0 : index
    %c0_9 = arith.constant 0 : index
    %9 = vector.load %arg4[%c0_8, %c0_9] : memref<8x128xf32, #tpu.memory_space<vmem>>, vector<8x128xf32>
    tpu.vector_store %arg4[%c0_8, %c0_9], %8 {strides = array<i32>} : memref<8x128xf32, #tpu.memory_space<vmem>>, vector<8x128xf32>,
    return
  }
  func.func @transform_0(%arg0: i32) -> (i32, i32, i32) {
    %c0_i32 = arith.constant 0 : i32
    %c0_i32_0 = arith.constant 0 : i32
    %c0_i32_1 = arith.constant 0 : i32
    return %arg0, %c0_i32, %c0_i32_0 : i32, i32, i32
  }
  func.func @transform_1(%arg0: i32) -> (i32, i32) {
    %c0_i32 = arith.constant 0 : i32
    %c0_i32_0 = arith.constant 0 : i32
    %c0_i32_1 = arith.constant 0 : i32
    return %c0_i32, %c0_i32_0 : i32, i32
  }
  func.func @transform_2(%arg0: i32) -> (i32, i32) {
    %c0_i32 = arith.constant 0 : i32
    %c0_i32_0 = arith.constant 0 : i32
    %c0_i32_1 = arith.constant 0 : i32
    return %c0_i32, %c0_i32_0 : i32, i32
  }
  func.func @transform_3(%arg0: i32) -> (i32, i32) {
    %c0_i32 = arith.constant 0 : i32
    %c0_i32_0 = arith.constant 0 : i32
    return %arg0, %c0_i32 : i32, i32
  }
}

</mosaic_0001>

<bundles_post_ra>
// kernel: box_predictor.1
= control target key start
LH: loop header
LB: loop body
LE: loop exit
PB: predicated region body
PF: predicated region fallthrough
CT: control target
= control target key end

     0   :  { %vm142_vm0 = vcmask 523264   ;;  %vm817_vm1 = vcmask 130112   ;;  %vm824_vm2 = vcmask 195712   ;;  %vm831_vm3 = vcmask 261312   ;;  %s2627_s0 = inlined_call_operand.vmem [shape: f32[8,128,64], index: 0, kind: input, shape index: {}]   ;;  %s2628_s1 = inlined_call_operand.vmem [shape: f32[128,128], index: 1, kind: input, shape index: {}]   ;;  %s2629_s2 = inlined_call_operand.vmem [shape: f32[1,128], index: 2, kind: input, shape index: {}]   ;;  %s2630_s3 = inlined_call_operand.vmem [shape: f32[8,128], index: 3, kind: output, shape index: {}]  }
   0x1   :  { %v30_v0 = vld [vmem:[%s2627_s0 + $0x80] sm:$0xff]  ;;  %v31_v2 = vld [vmem:[%s2627_s0 + $0x88] sm:$0xff]  ;;  %v32_v8 = vld [vmem:[%s2627_s0 + $0x90] sm:$0xff]  ;;  %vm838_vm4 = vcmask 326912   ;;  %vm845_vm5 = vcmask 392512   ;;  %vm852_vm6 = vcmask 458112  }
   0x2   :  { %v14_v1 = vld [vmem:[%s2627_s0] sm:$0xff]  ;;  %v191_v3 = vsel %vm142_vm0, %v30_v0, 0.0  ;;  %v15_v5 = vld [vmem:[%s2627_s0 + $0x8] sm:$0xff]  ;;  %v194_v6 = vsel %vm142_vm0, %v31_v2, 0.0  ;;  %v16_v9 = vld [vmem:[%s2627_s0 + $0x10] sm:$0xff]  ;;  %v197_v10 = vsel %vm142_vm0, %v32_v8, 0.0 }
   0x3   :  { %v143_v4 = vsel %vm142_vm0, %v14_v1, 0.0  ;;  %192 = vadd.xlane.f32.xlu1 %v191_v3  ;;  %v146_v7 = vsel %vm142_vm0, %v15_v5, 0.0  ;;  %v149_v11 = vsel %vm142_vm0, %v16_v9, 0.0  ;;  %v47_v12 = vld [vmem:[%s2627_s0 + $0x108] sm:$0xff]  ;;  %v46_v13 = vld [vmem:[%s2627_s0 + $0x100] sm:$0xff]  ;;  %v33_v16 = vld [vmem:[%s2627_s0 + $0x98] sm:$0xff] }
   0x4   :  { %144 = vadd.xlane.f32.xlu0 %v143_v4  ;;  %v242_v14 = vsel %vm142_vm0, %v47_v12, 0.0  ;;  %v239_v15 = vsel %vm142_vm0, %v46_v13, 0.0  ;;  %v17_v17 = vld [vmem:[%s2627_s0 + $0x18] sm:$0xff]  ;;  %v200_v18 = vsel %vm142_vm0, %v33_v16, 0.0  ;;  %v62_v20 = vld [vmem:[%s2627_s0 + $0x180] sm:$0xff]  ;;  %v48_v21 = vld [vmem:[%s2627_s0 + $0x110] sm:$0xff] }
   0x5   :  { %v152_v19 = vsel %vm142_vm0, %v17_v17, 0.0  ;;  %v287_v22 = vsel %vm142_vm0, %v62_v20, 0.0  ;;  %v245_v23 = vsel %vm142_vm0, %v48_v21, 0.0  ;;  %v18_v24 = vld [vmem:[%s2627_s0 + $0x20] sm:$0xff]  ;;  %v63_v25 = vld [vmem:[%s2627_s0 + $0x188] sm:$0xff]  ;;  %v49_v28 = vld [vmem:[%s2627_s0 + $0x118] sm:$0xff] }
   0x6   :  { %v155_v26 = vsel %vm142_vm0, %v18_v24, 0.0  ;;  %v290_v27 = vsel %vm142_vm0, %v63_v25, 0.0  ;;  %v34_v29 = vld [vmem:[%s2627_s0 + $0xa0] sm:$0xff]  ;;  %v248_v30 = vsel %vm142_vm0, %v49_v28, 0.0  ;;  %v64_v33 = vld [vmem:[%s2627_s0 + $0x190] sm:$0xff]  ;;  %v19_v36 = vld [vmem:[%s2627_s0 + $0x28] sm:$0xff] }
   0x7   :  { %195 = vadd.xlane.f32.xlu1 %v194_v6  ;;  %v203_v31 = vsel %vm142_vm0, %v34_v29, 0.0  ;;  %v78_v32 = vld [vmem:[%s2627_s0 + $0x200] sm:$0xff]  ;;  %v293_v35 = vsel %vm142_vm0, %v64_v33, 0.0  ;;  %v79_v37 = vld [vmem:[%s2627_s0 + $0x208] sm:$0xff]  ;;  %v158_v38 = vsel %vm142_vm0, %v19_v36, 0.0  ;;  %v80_v44 = vld [vmem:[%s2627_s0 + $0x210] sm:$0xff] }
   0x8   :  { %147 = vadd.xlane.f32.xlu0 %v146_v7  ;;  %v335_v34 = vsel %vm142_vm0, %v78_v32, 0.0  ;;  %v338_v39 = vsel %vm142_vm0, %v79_v37, 0.0  ;;  %v50_v40 = vld [vmem:[%s2627_s0 + $0x120] sm:$0xff]  ;;  %v35_v41 = vld [vmem:[%s2627_s0 + $0xa8] sm:$0xff]  ;;  %v65_v45 = vld [vmem:[%s2627_s0 + $0x198] sm:$0xff]  ;;  %v341_v46 = vsel %vm142_vm0, %v80_v44, 0.0 }
   0x9   :  { %v251_v42 = vsel %vm142_vm0, %v50_v40, 0.0  ;;  %v206_v43 = vsel %vm142_vm0, %v35_v41, 0.0  ;;  %v296_v47 = vsel %vm142_vm0, %v65_v45, 0.0  ;;  %v95_v48 = vld [vmem:[%s2627_s0 + $0x288] sm:$0xff]  ;;  %v94_v49 = vld [vmem:[%s2627_s0 + $0x280] sm:$0xff]  ;;  %v36_v52 = vld [vmem:[%s2627_s0 + $0xb0] sm:$0xff] }
   0xa   :  { %v386_v50 = vsel %vm142_vm0, %v95_v48, 0.0  ;;  %v383_v51 = vsel %vm142_vm0, %v94_v49, 0.0  ;;  %v20_v53 = vld [vmem:[%s2627_s0 + $0x30] sm:$0xff]  ;;  %v209_v54 = vsel %vm142_vm0, %v36_v52, 0.0  ;;  %v66_v56 = vld [vmem:[%s2627_s0 + $0x1a0] sm:$0xff]  ;;  %v51_v57 = vld [vmem:[%s2627_s0 + $0x128] sm:$0xff] }
   0xb   :  { %198 = vadd.xlane.f32.xlu1 %v197_v10  ;;  %v161_v55 = vsel %vm142_vm0, %v20_v53, 0.0  ;;  %v299_v58 = vsel %vm142_vm0, %v66_v56, 0.0  ;;  %v254_v59 = vsel %vm142_vm0, %v51_v57, 0.0  ;;  %v96_v60 = vld [vmem:[%s2627_s0 + $0x290] sm:$0xff]  ;;  %v81_v61 = vld [vmem:[%s2627_s0 + $0x218] sm:$0xff]  ;;  %v111_v0 = vld [vmem:[%s2627_s0 + $0x308] sm:$0xff] }
   0xc   :  { %150 = vadd.xlane.f32.xlu0 %v149_v11  ;;  %v389_v62 = vsel %vm142_vm0, %v96_v60, 0.0  ;;  %v344_v63 = vsel %vm142_vm0, %v81_v61, 0.0  ;;  %v110_v1 = vld [vmem:[%s2627_s0 + $0x300] sm:$0xff]  ;;  %v434_v2 = vsel %vm142_vm0, %v111_v0, 0.0  ;;  %v37_v4 = vld [vmem:[%s2627_s0 + $0xb8] sm:$0xff]  ;;  %v67_v8 = vld [vmem:[%s2627_s0 + $0x1a8] sm:$0xff] }
   0xd   :  { %v431_v3 = vsel %vm142_vm0, %v110_v1, 0.0  ;;  %v21_v5 = vld [vmem:[%s2627_s0 + $0x38] sm:$0xff]  ;;  %v212_v6 = vsel %vm142_vm0, %v37_v4, 0.0  ;;  %v52_v9 = vld [vmem:[%s2627_s0 + $0x130] sm:$0xff]  ;;  %v302_v10 = vsel %vm142_vm0, %v67_v8, 0.0  ;;  %v82_v13 = vld [vmem:[%s2627_s0 + $0x220] sm:$0xff] }
   0xe   :  { %v164_v7 = vsel %vm142_vm0, %v21_v5, 0.0  ;;  %v257_v11 = vsel %vm142_vm0, %v52_v9, 0.0  ;;  %v97_v12 = vld [vmem:[%s2627_s0 + $0x298] sm:$0xff]  ;;  %v126_v16 = vld [vmem:[%s2627_s0 + $0x380] sm:$0xff]  ;;  %v112_v17 = vld [vmem:[%s2627_s0 + $0x310] sm:$0xff]  ;;  %vm859_vm7 = vcmask 523712  }
   0xf   :  { %243 = vadd.xlane.f32.xlu1 %v242_v14  ;;  %v392_v14 = vsel %vm142_vm0, %v97_v12, 0.0  ;;  %v22_v20 = vld [vmem:[%s2627_s0 + $0x40] sm:$0xff]  ;;  %v127_v21 = vld [vmem:[%s2627_s0 + $0x388] sm:$0xff]  ;;  %v53_v24 = vld [vmem:[%s2627_s0 + $0x138] sm:$0xff]  ;;  %vm866_vm8 = vcmask 589312   ;;  %vm873_vm9 = vcmask 654912  }
  0x10   :  { %240 = vadd.xlane.f32.xlu0 %v239_v15  ;;  %v347_v15 = vsel %vm142_vm0, %v82_v13, 0.0  ;;  %v38_v25 = vld [vmem:[%s2627_s0 + $0xc0] sm:$0xff]  ;;  %v83_v28 = vld [vmem:[%s2627_s0 + $0x228] sm:$0xff]  ;;  %v68_v29 = vld [vmem:[%s2627_s0 + $0x1b0] sm:$0xff]  ;;  %vm880_vm10 = vcmask 720512   ;;  %vm1641_vm11 = vmmov 0  }
  0x11   :  { %v113_v32 = vld [vmem:[%s2627_s0 + $0x318] sm:$0xff]  ;;  %v98_v33 = vld [vmem:[%s2627_s0 + $0x2a0] sm:$0xff]  ;;  %v23_v36 = vld [vmem:[%s2627_s0 + $0x48] sm:$0xff]  ;;  %vm887_vm12 = vcmask 786112   ;;  %vm894_vm13 = vcmask 851712   ;;  %vm901_vm14 = vcmask 917312  }
  0x12   :  { %v128_v37 = vld [vmem:[%s2627_s0 + $0x390] sm:$0xff]  ;;  %v54_v40 = vld [vmem:[%s2627_s0 + $0x140] sm:$0xff]  ;;  %v39_v41 = vld [vmem:[%s2627_s0 + $0xc8] sm:$0xff]  ;;  %vm908_vm15 = vcmask 982912  }
  0x13   :  { %201 = vadd.xlane.f32.xlu1 %v200_v18  ;;  %v479_v18 = vsel %vm142_vm0, %v126_v16, 0.0  ;;  %v84_v44 = vld [vmem:[%s2627_s0 + $0x230] sm:$0xff]  ;;  %v69_v45 = vld [vmem:[%s2627_s0 + $0x1b8] sm:$0xff]  ;;  %v114_v48 = vld [vmem:[%s2627_s0 + $0x320] sm:$0xff] }
  0x14   :  { %153 = vadd.xlane.f32.xlu0 %v152_v19  ;;  %v437_v19 = vsel %vm142_vm0, %v112_v17, 0.0  ;;  %v99_v49 = vld [vmem:[%s2627_s0 + $0x2a8] sm:$0xff]  ;;  %v24_v52 = vld [vmem:[%s2627_s0 + $0x50] sm:$0xff]  ;;  %v129_v53 = vld [vmem:[%s2627_s0 + $0x398] sm:$0xff] }
  0x15   :  { %v55_v56 = vld [vmem:[%s2627_s0 + $0x148] sm:$0xff]  ;;  %v40_v57 = vld [vmem:[%s2627_s0 + $0xd0] sm:$0xff]  ;;  %v85_v60 = vld [vmem:[%s2627_s0 + $0x238] sm:$0xff] }
  0x16   :  { %v70_v61 = vld [vmem:[%s2627_s0 + $0x1c0] sm:$0xff]  ;;  %v115_v0 = vld [vmem:[%s2627_s0 + $0x328] sm:$0xff]  ;;  %v100_v1 = vld [vmem:[%s2627_s0 + $0x2b0] sm:$0xff] }
  0x17   :  { %288 = vadd.xlane.f32.xlu1 %v287_v22  ;;  %v167_v22 = vsel %vm142_vm0, %v22_v20, 0.0  ;;  %v25_v4 = vld [vmem:[%s2627_s0 + $0x58] sm:$0xff]  ;;  %v130_v5 = vld [vmem:[%s2627_s0 + $0x3a0] sm:$0xff]  ;;  %v56_v8 = vld [vmem:[%s2627_s0 + $0x150] sm:$0xff] }
  0x18   :  { %246 = vadd.xlane.f32.xlu0 %v245_v23  ;;  %v482_v23 = vsel %vm142_vm0, %v127_v21, 0.0  ;;  %v41_v9 = vld [vmem:[%s2627_s0 + $0xd8] sm:$0xff]  ;;  %v86_v12 = vld [vmem:[%s2627_s0 + $0x240] sm:$0xff]  ;;  %v71_v13 = vld [vmem:[%s2627_s0 + $0x1c8] sm:$0xff] }
  0x19   :  { %v314_v16 = vsel %vm142_vm0, %v71_v13, 0.0 }
  0x1b   :  { %156 = vadd.xlane.f32.xlu1 %v155_v26  ;;  %v260_v26 = vsel %vm142_vm0, %v53_v24, 0.0 }
  0x1c   :  { %291 = vadd.xlane.f32.xlu0 %v290_v27  ;;  %v215_v27 = vsel %vm142_vm0, %v38_v25, 0.0 }
  0x1f   :  { %249 = vadd.xlane.f32.xlu1 %v248_v30  ;;  %v350_v30 = vsel %vm142_vm0, %v83_v28, 0.0 }
  0x20   :  { %204 = vadd.xlane.f32.xlu0 %v203_v31  ;;  %v305_v31 = vsel %vm142_vm0, %v68_v29, 0.0 }
  0x23   :  { %336 = vadd.xlane.f32.xlu1 %v335_v34  ;;  %v440_v34 = vsel %vm142_vm0, %v113_v32, 0.0 }
  0x24   :  { %294 = vadd.xlane.f32.xlu0 %v293_v35  ;;  %v395_v35 = vsel %vm142_vm0, %v98_v33, 0.0 }
  0x27   :  { %159 = vadd.xlane.f32.xlu1 %v158_v38  ;;  %v170_v38 = vsel %vm142_vm0, %v23_v36, 0.0 }
  0x28   :  { %339 = vadd.xlane.f32.xlu0 %v338_v39  ;;  %v485_v39 = vsel %vm142_vm0, %v128_v37, 0.0 }
  0x2b   :  { %252 = vadd.xlane.f32.xlu1 %v251_v42  ;;  %v263_v42 = vsel %vm142_vm0, %v54_v40, 0.0  ;;  %v42_v40 = vld [vmem:[%s2627_s0 + $0xe0] sm:$0xff] }
  0x2c   :  { %207 = vadd.xlane.f32.xlu0 %v206_v43  ;;  %v218_v43 = vsel %vm142_vm0, %v39_v41, 0.0 }
  0x2f   :  { %342 = vadd.xlane.f32.xlu1 %v341_v46  ;;  %v353_v46 = vsel %vm142_vm0, %v84_v44, 0.0 }
  0x30   :  { %297 = vadd.xlane.f32.xlu0 %v296_v47  ;;  %v308_v47 = vsel %vm142_vm0, %v69_v45, 0.0 }
  0x33   :  { %387 = vadd.xlane.f32.xlu1 %v386_v50  ;;  %v443_v50 = vsel %vm142_vm0, %v114_v48, 0.0 }
  0x34   :  { %384 = vadd.xlane.f32.xlu0 %v383_v51  ;;  %v398_v51 = vsel %vm142_vm0, %v99_v49, 0.0  ;;  %v227_v49 = vsel %vm142_vm0, %v42_v40, 0.0 }
  0x37   :  { %210 = vadd.xlane.f32.xlu1 %v209_v54  ;;  %v173_v54 = vsel %vm142_vm0, %v24_v52, 0.0 }
  0x38   :  { %162 = vadd.xlane.f32.xlu0 %v161_v55  ;;  %v488_v55 = vsel %vm142_vm0, %v129_v53, 0.0 }
  0x3b   :  { %300 = vadd.xlane.f32.xlu1 %v299_v58  ;;  %v266_v58 = vsel %vm142_vm0, %v55_v56, 0.0 }
  0x3c   :  { %255 = vadd.xlane.f32.xlu0 %v254_v59  ;;  %v221_v59 = vsel %vm142_vm0, %v40_v57, 0.0 }
  0x3f   :  { %390 = vadd.xlane.f32.xlu1 %v389_v62  ;;  %v356_v62 = vsel %vm142_vm0, %v85_v60, 0.0 }
  0x40   :  { %345 = vadd.xlane.f32.xlu0 %v344_v63  ;;  %v311_v63 = vsel %vm142_vm0, %v70_v61, 0.0 }
  0x43   :  { %435 = vadd.xlane.f32.xlu1 %v434_v2  ;;  %v446_v2 = vsel %vm142_vm0, %v115_v0, 0.0 }
  0x44   :  { %432 = vadd.xlane.f32.xlu0 %v431_v3  ;;  %v401_v3 = vsel %vm142_vm0, %v100_v1, 0.0 }
  0x47   :  { %213 = vadd.xlane.f32.xlu1 %v212_v6  ;;  %v176_v6 = vsel %vm142_vm0, %v25_v4, 0.0  ;;  %v102_v4 = vld [vmem:[%s2627_s0 + $0x2c0] sm:$0xff] }
  0x48   :  { %165 = vadd.xlane.f32.xlu0 %v164_v7  ;;  %v491_v7 = vsel %vm142_vm0, %v130_v5, 0.0 }
  0x4b   :  { %303 = vadd.xlane.f32.xlu1 %v302_v10  ;;  %v269_v10 = vsel %vm142_vm0, %v56_v8, 0.0 }
  0x4c   :  { %258 = vadd.xlane.f32.xlu0 %v257_v11  ;;  %v224_v11 = vsel %vm142_vm0, %v41_v9, 0.0 }
  0x4f   :  { %393 = vadd.xlane.f32.xlu1 %v392_v14  ;;  %v806_v14 = vlaneseq }
  0x50   :  { %348 = vadd.xlane.f32.xlu0 %v347_v15  ;;  %v359_v15 = vsel %vm142_vm0, %v86_v12, 0.0 }
  0x51   :  { %v1951_v17 = vand.u32 127, %v806_v14  ;;  %v1959_v20 = vshrl.u32 %v806_v14, 7 }
  0x53   :  { %480 = vadd.xlane.f32.xlu1 %v479_v18  ;;  %v116_v18 = vld [vmem:[%s2627_s0 + $0x330] sm:$0xff]  ;;  %v812_v21 = vadd.s32 4294967288, %v1951_v17  ;;  %v1972_v28 = vsub.s32 %v1951_v17, %v1959_v20 }
  0x54   :  { %438 = vadd.xlane.f32.xlu0 %v437_v19  ;;  %v101_v19 = vld [vmem:[%s2627_s0 + $0x2b8] sm:$0xff]  ;;  %v449_v24 = vsel %vm142_vm0, %v116_v18, 0.0 }
  0x55   :  { %v404_v25 = vsel %vm142_vm0, %v101_v19, 0.0  ;;  %v1976_v32 = vsub.s32 %v812_v21, %v1959_v20  ;;  %v833_v21 = vadd.s32 4294967264, %v1951_v17 }
  0x57   :  { %168 = vadd.xlane.f32.xlu1 %v167_v22 }
  0x58   :  { %483 = vadd.xlane.f32.xlu0 %v482_v23 }
  0x5b   :  { %261 = vadd.xlane.f32.xlu1 %v260_v26  ;;  %v26_v26 = vld [vmem:[%s2627_s0 + $0x60] sm:$0xff] }
  0x5c   :  { %216 = vadd.xlane.f32.xlu0 %v215_v27  ;;  %v131_v27 = vld [vmem:[%s2627_s0 + $0x3a8] sm:$0xff] }
  0x5d   :  { %v494_v36 = vsel %vm142_vm0, %v131_v27, 0.0 }
  0x5f   :  { %351 = vadd.xlane.f32.xlu1 %v350_v30  ;;  %v819_v30 = vadd.s32 4294967280, %v1951_v17 }
  0x60   :  { %306 = vadd.xlane.f32.xlu0 %v305_v31 }
  0x63   :  { %441 = vadd.xlane.f32.xlu1 %v440_v34 }
  0x64   :  { %396 = vadd.xlane.f32.xlu0 %v395_v35  ;;  %v179_v35 = vsel %vm142_vm0, %v26_v26, 0.0 }
  0x67   :  { %171 = vadd.xlane.f32.xlu1 %v170_v38 }
  0x68   :  { %486 = vadd.xlane.f32.xlu0 %v485_v39  ;;  %v57_v39 = vld [vmem:[%s2627_s0 + $0x158] sm:$0xff] }
  0x69   :  { %v272_v48 = vsel %vm142_vm0, %v57_v39, 0.0 }
  0x6b   :  { %264 = vadd.xlane.f32.xlu1 %v263_v42  ;;  %v1988_v42 = vsub.s32 %v819_v30, %v1959_v20  ;;  %v58_v30 = vld [vmem:[%s2627_s0 + $0x160] sm:$0xff] }
  0x6c   :  { %219 = vadd.xlane.f32.xlu0 %v218_v43 }
  0x6f   :  { %354 = vadd.xlane.f32.xlu1 %v353_v46 }
  0x70   :  { %309 = vadd.xlane.f32.xlu0 %v308_v47 }
  0x73   :  { %444 = vadd.xlane.f32.xlu1 %v443_v50 }
  0x74   :  { %399 = vadd.xlane.f32.xlu0 %v398_v51 }
  0x77   :  { %174 = vadd.xlane.f32.xlu1 %v173_v54  ;;  %v87_v54 = vld [vmem:[%s2627_s0 + $0x248] sm:$0xff] }
  0x78   :  { %489 = vadd.xlane.f32.xlu0 %v488_v55  ;;  %v72_v55 = vld [vmem:[%s2627_s0 + $0x1d0] sm:$0xff]  ;;  %v362_v61 = vsel %vm142_vm0, %v87_v54, 0.0 }
  0x7b   :  { %267 = vadd.xlane.f32.xlu1 %v266_v58  ;;  %v826_v58 = vadd.s32 4294967272, %v1951_v17 }
  0x7c   :  { %222 = vadd.xlane.f32.xlu0 %v221_v59 }
  0x7f   :  { %357 = vadd.xlane.f32.xlu1 %v356_v62  ;;  %v317_v62 = vsel %vm142_vm0, %v72_v55, 0.0 }
  0x80   :  { %312 = vadd.xlane.f32.xlu0 %v311_v63 }
  0x83   :  { %447 = vadd.xlane.f32.xlu1 %v446_v2 }
  0x84   :  { %402 = vadd.xlane.f32.xlu0 %v401_v3  ;;  %v117_v3 = vld [vmem:[%s2627_s0 + $0x338] sm:$0xff] }
  0x87   :  { %177 = vadd.xlane.f32.xlu1 %v176_v6 }
  0x88   :  { %492 = vadd.xlane.f32.xlu0 %v491_v7  ;;  %v2019_v7 = vsub.s32 %v826_v58, %v1959_v20  ;;  %v103_v58 = vld [vmem:[%s2627_s0 + $0x2c8] sm:$0xff] }
  0x8b   :  { %270 = vadd.xlane.f32.xlu1 %v269_v10  ;;  %v452_v10 = vsel %vm142_vm0, %v117_v3, 0.0 }
  0x8c   :  { %225 = vadd.xlane.f32.xlu0 %v224_v11  ;;  %v407_v11 = vsel %vm142_vm0, %v102_v4, 0.0 }
  0x8f   :  { %360 = vadd.xlane.f32.xlu1 %v359_v15  ;;  %v27_v15 = vld [vmem:[%s2627_s0 + $0x68] sm:$0xff] }
  0x90   :  { %315 = vadd.xlane.f32.xlu0 %v314_v16  ;;  %v193_v22 = vpop.xlane.xlu1 %192  ;;  %v132_v16 = vld [vmem:[%s2627_s0 + $0x3b0] sm:$0xff] }
  0x91   :  { %v145_v23 = vpop.xlane.xlu0 %144  ;;  %v543_v29 = vmul.f32 0.015625, %v193_v22 }
  0x92   :  { %v527_v31 = vmul.f32 0.015625, %v145_v23 }
  0x93   :  { %450 = vadd.xlane.f32.xlu1 %v449_v24  ;;  %v920_v41 = vrot.slane %v543_v29, %v1972_v28  ;;  %v182_v24 = vsel %vm142_vm0, %v27_v15, 0.0 }
  0x94   :  { %405 = vadd.xlane.f32.xlu0 %v404_v25  ;;  %v196_v33 = vpop.xlane.xlu1 %195  ;;  %v811_v43 = vrot.slane %v527_v31, %v1972_v28  ;;  %v497_v25 = vsel %vm142_vm0, %v132_v16, 0.0  ;;  %v43_v31 = vld [vmem:[%s2627_s0 + $0xe8] sm:$0xff] }
  0x95   :  { %v148_v34 = vpop.xlane.xlu0 %147  ;;  %v544_v37 = vmul.f32 0.015625, %v196_v33  ;;  %v230_v39 = vsel %vm142_vm0, %v43_v31, 0.0 }
  0x96   :  { %v528_v38 = vmul.f32 0.015625, %v148_v34 }
  0x97   :  { %v924_v44 = vrot.slane %v544_v37, %v1976_v32  ;;  %180 = vadd.xlane.f32.xlu1 %v179_v35  ;;  %v2045_v35 = vsub.s32 %v833_v21, %v1959_v20  ;;  %v44_v21 = vld [vmem:[%s2627_s0 + $0xf0] sm:$0xff] }
  0x98   :  { %v816_v45 = vrot.slane %v528_v38, %v1976_v32  ;;  %495 = vadd.xlane.f32.xlu0 %v494_v36  ;;  %v199_v46 = vpop.xlane.xlu1 %198  ;;  %v275_v38 = vsel %vm142_vm0, %v58_v30, 0.0 }
  0x99   :  { %v151_v47 = vpop.xlane.xlu0 %150  ;;  %v925_v50 = vsel %vm817_vm1, %v924_v44, %v920_v41  ;;  %v545_v52 = vmul.f32 0.015625, %v199_v46  ;;  %v88_v44 = vld [vmem:[%s2627_s0 + $0x250] sm:$0xff] }
  0x9a   :  { %v818_v51 = vsel %vm817_vm1, %v816_v45, %v811_v43  ;;  %v529_v53 = vmul.f32 0.015625, %v151_v47  ;;  %v73_v45 = vld [vmem:[%s2627_s0 + $0x1d8] sm:$0xff] }
  0x9b   :  { %v929_v56 = vrot.slane %v545_v52, %v1988_v42  ;;  %273 = vadd.xlane.f32.xlu1 %v272_v48  ;;  %v320_v52 = vsel %vm142_vm0, %v73_v45, 0.0 }
  0x9c   :  { %v823_v57 = vrot.slane %v529_v53, %v1988_v42  ;;  %228 = vadd.xlane.f32.xlu0 %v227_v49  ;;  %v244_v59 = vpop.xlane.xlu1 %243 }
  0x9d   :  { %v241_v60 = vpop.xlane.xlu0 %240  ;;  %v930_v63 = vsel %vm824_vm2, %v929_v56, %v925_v50  ;;  %v560_v1 = vmul.f32 0.015625, %v244_v59 }
  0x9e   :  { %v825_v0 = vsel %vm824_vm2, %v823_v57, %v818_v51  ;;  %v559_v2 = vmul.f32 0.015625, %v241_v60  ;;  %v365_v51 = vsel %vm142_vm0, %v88_v44, 0.0  ;;  %v118_v57 = vld [vmem:[%s2627_s0 + $0x340] sm:$0xff] }
  0x9f   :  { %v1003_v5 = vrot.slane %v560_v1, %v1976_v32  ;;  %363 = vadd.xlane.f32.xlu1 %v362_v61  ;;  %v840_v61 = vadd.s32 4294967256, %v1951_v17  ;;  %v410_v1 = vsel %vm142_vm0, %v103_v58, 0.0 }
  0xa0   :  { %v999_v6 = vrot.slane %v559_v2, %v1972_v28  ;;  %318 = vadd.xlane.f32.xlu0 %v317_v62  ;;  %v202_v8 = vpop.xlane.xlu1 %201 }
  0xa1   :  { %v154_v9 = vpop.xlane.xlu0 %153  ;;  %v546_v13 = vmul.f32 0.015625, %v202_v8 }
  0xa2   :  { %v1004_v12 = vsel %vm817_vm1, %v1003_v5, %v999_v6  ;;  %v530_v14 = vmul.f32 0.015625, %v154_v9  ;;  %v28_v5 = vld [vmem:[%s2627_s0 + $0x70] sm:$0xff]  ;;  %v133_v6 = vld [vmem:[%s2627_s0 + $0x3b8] sm:$0xff] }
  0xa3   :  { %v934_v18 = vrot.slane %v546_v13, %v2019_v7  ;;  %453 = vadd.xlane.f32.xlu1 %v452_v10  ;;  %v2084_v10 = vsub.s32 %v840_v61, %v1959_v20  ;;  %v185_v13 = vsel %vm142_vm0, %v28_v5, 0.0 }
  0xa4   :  { %v830_v19 = vrot.slane %v530_v14, %v2019_v7  ;;  %408 = vadd.xlane.f32.xlu0 %v407_v11  ;;  %v289_v22 = vpop.xlane.xlu1 %288  ;;  %v500_v14 = vsel %vm142_vm0, %v133_v6, 0.0 }
  0xa5   :  { %v247_v23 = vpop.xlane.xlu0 %246  ;;  %v935_v26 = vsel %vm831_vm3, %v934_v18, %v930_v63  ;;  %v575_v33 = vmul.f32 0.015625, %v289_v22 }
  0xa6   :  { %v832_v27 = vsel %vm831_vm3, %v830_v19, %v825_v0  ;;  %v561_v29 = vmul.f32 0.015625, %v247_v23  ;;  %v455_v0 = vsel %vm142_vm0, %v118_v57, 0.0  ;;  %v59_v19 = vld [vmem:[%s2627_s0 + $0x168] sm:$0xff] }
  0xa7   :  { %183 = vadd.xlane.f32.xlu1 %v182_v24  ;;  %v1078_v46 = vrot.slane %v575_v33, %v1972_v28 }
  0xa8   :  { %v1008_v34 = vrot.slane %v561_v29, %v1988_v42  ;;  %498 = vadd.xlane.f32.xlu0 %v497_v25  ;;  %v157_v36 = vpop.xlane.xlu1 %156  ;;  %v233_v29 = vsel %vm142_vm0, %v44_v21, 0.0 }
  0xa9   :  { %v292_v37 = vpop.xlane.xlu0 %291  ;;  %v531_v41 = vmul.f32 0.015625, %v157_v36  ;;  %v89_v36 = vld [vmem:[%s2627_s0 + $0x258] sm:$0xff] }
  0xaa   :  { %v1009_v40 = vsel %vm824_vm2, %v1008_v34, %v1004_v12  ;;  %v576_v43 = vmul.f32 0.015625, %v292_v37  ;;  %v74_v37 = vld [vmem:[%s2627_s0 + $0x1e0] sm:$0xff] }
  0xab   :  { %v837_v47 = vrot.slane %v531_v41, %v2045_v35  ;;  %276 = vadd.xlane.f32.xlu1 %v275_v38  ;;  %v323_v44 = vsel %vm142_vm0, %v74_v37, 0.0 }
  0xac   :  { %v1082_v48 = vrot.slane %v576_v43, %v1976_v32  ;;  %231 = vadd.xlane.f32.xlu0 %v230_v39  ;;  %v250_v49 = vpop.xlane.xlu1 %249  ;;  %v368_v43 = vsel %vm142_vm0, %v89_v36, 0.0 }
  0xad   :  { %v205_v50 = vpop.xlane.xlu0 %204  ;;  %v839_v53 = vsel %vm838_vm4, %v837_v47, %v832_v27  ;;  %v562_v55 = vmul.f32 0.015625, %v250_v49  ;;  %v278_v27 = vsel %vm142_vm0, %v59_v19, 0.0  ;;  %v119_v49 = vld [vmem:[%s2627_s0 + $0x348] sm:$0xff] }
  0xae   :  { %v1083_v54 = vsel %vm817_vm1, %v1082_v48, %v1078_v46  ;;  %v547_v56 = vmul.f32 0.015625, %v205_v50  ;;  %v104_v50 = vld [vmem:[%s2627_s0 + $0x2d0] sm:$0xff] }
  0xaf   :  { %v1013_v59 = vrot.slane %v562_v55, %v2019_v7  ;;  %366 = vadd.xlane.f32.xlu1 %v365_v51  ;;  %v413_v57 = vsel %vm142_vm0, %v104_v50, 0.0 }
  0xb0   :  { %v939_v60 = vrot.slane %v547_v56, %v2045_v35  ;;  %321 = vadd.xlane.f32.xlu0 %v320_v52  ;;  %v337_v62 = vpop.xlane.xlu1 %336  ;;  %v458_v56 = vsel %vm142_vm0, %v119_v49, 0.0 }
  0xb1   :  { %v295_v63 = vpop.xlane.xlu0 %294  ;;  %v1014_v2 = vsel %vm831_vm3, %v1013_v59, %v1009_v40  ;;  %v591_v8 = vmul.f32 0.015625, %v337_v62  ;;  %v29_v62 = vld [vmem:[%s2627_s0 + $0x78] sm:$0xff] }
  0xb2   :  { %v940_v3 = vsel %vm838_vm4, %v939_v60, %v935_v26  ;;  %v577_v4 = vmul.f32 0.015625, %v295_v63  ;;  %v134_v63 = vld [vmem:[%s2627_s0 + $0x3c0] sm:$0xff]  ;;  %v188_v5 = vsel %vm142_vm0, %v29_v62, 0.0 }
  0xb3   :  { %456 = vadd.xlane.f32.xlu1 %v455_v0  ;;  %v1157_v22 = vrot.slane %v591_v8, %v1972_v28  ;;  %v503_v6 = vsel %vm142_vm0, %v134_v63, 0.0 }
  0xb4   :  { %v1087_v9 = vrot.slane %v577_v4, %v1988_v42  ;;  %411 = vadd.xlane.f32.xlu0 %v410_v1  ;;  %v160_v11 = vpop.xlane.xlu1 %159 }
  0xb5   :  { %v340_v12 = vpop.xlane.xlu0 %339  ;;  %v532_v16 = vmul.f32 0.015625, %v160_v11 }
  0xb6   :  { %v1088_v15 = vsel %vm824_vm2, %v1087_v9, %v1083_v54  ;;  %v592_v18 = vmul.f32 0.015625, %v340_v12  ;;  %v60_v12 = vld [vmem:[%s2627_s0 + $0x170] sm:$0xff] }
  0xb7   :  { %v844_v23 = vrot.slane %v532_v16, %v2084_v10  ;;  %186 = vadd.xlane.f32.xlu1 %v185_v13  ;;  %v45_v13 = vld [vmem:[%s2627_s0 + $0xf8] sm:$0xff]  ;;  %v281_v19 = vsel %vm142_vm0, %v60_v12, 0.0 }
  0xb8   :  { %v1161_v24 = vrot.slane %v592_v18, %v1976_v32  ;;  %501 = vadd.xlane.f32.xlu0 %v500_v14  ;;  %v253_v25 = vpop.xlane.xlu1 %252  ;;  %v236_v21 = vsel %vm142_vm0, %v45_v13, 0.0 }
  0xb9   :  { %v208_v26 = vpop.xlane.xlu0 %207  ;;  %v846_v30 = vsel %vm845_vm5, %v844_v23, %v839_v53  ;;  %v563_v33 = vmul.f32 0.015625, %v253_v25  ;;  %v847_v53 = vadd.s32 4294967248, %v1951_v17 }
  0xba   :  { %v1162_v31 = vsel %vm817_vm1, %v1161_v24, %v1157_v22  ;;  %v548_v34 = vmul.f32 0.015625, %v208_v26  ;;  %v90_v26 = vld [vmem:[%s2627_s0 + $0x260] sm:$0xff] }
  0xbb   :  { %v1018_v38 = vrot.slane %v563_v33, %v2045_v35  ;;  %279 = vadd.xlane.f32.xlu1 %v278_v27  ;;  %v75_v27 = vld [vmem:[%s2627_s0 + $0x1e8] sm:$0xff] }
  0xbc   :  { %v944_v39 = vrot.slane %v548_v34, %v2084_v10  ;;  %234 = vadd.xlane.f32.xlu0 %v233_v29  ;;  %v343_v40 = vpop.xlane.xlu1 %342  ;;  %v326_v36 = vsel %vm142_vm0, %v75_v27, 0.0 }
  0xbd   :  { %v298_v41 = vpop.xlane.xlu0 %297  ;;  %v1019_v45 = vsel %vm838_vm4, %v1018_v38, %v1014_v2  ;;  %v593_v47 = vmul.f32 0.015625, %v343_v40  ;;  %v2136_v2 = vsub.s32 %v847_v53, %v1959_v20 }
  0xbe   :  { %v945_v46 = vsel %vm845_vm5, %v944_v39, %v940_v3  ;;  %v578_v48 = vmul.f32 0.015625, %v298_v41  ;;  %v120_v41 = vld [vmem:[%s2627_s0 + $0x350] sm:$0xff] }
  0xbf   :  { %v1166_v51 = vrot.slane %v593_v47, %v1988_v42  ;;  %369 = vadd.xlane.f32.xlu1 %v368_v43  ;;  %v105_v43 = vld [vmem:[%s2627_s0 + $0x2d8] sm:$0xff]  ;;  %v854_v47 = vadd.s32 4294967240, %v1951_v17  ;;  %v461_v49 = vsel %vm142_vm0, %v120_v41, 0.0 }
  0xc0   :  { %v1092_v52 = vrot.slane %v578_v48, %v2019_v7  ;;  %324 = vadd.xlane.f32.xlu0 %v323_v44  ;;  %v388_v54 = vpop.xlane.xlu1 %387  ;;  %v416_v50 = vsel %vm142_vm0, %v105_v43, 0.0 }
  0xc1   :  { %v385_v55 = vpop.xlane.xlu0 %384  ;;  %v1167_v58 = vsel %vm824_vm2, %v1166_v51, %v1162_v31  ;;  %v608_v60 = vmul.f32 0.015625, %v388_v54 }
  0xc2   :  { %v1093_v59 = vsel %vm831_vm3, %v1092_v52, %v1088_v15  ;;  %v607_v61 = vmul.f32 0.015625, %v385_v55  ;;  %v61_v55 = vld [vmem:[%s2627_s0 + $0x178] sm:$0xff] }
  0xc3   :  { %v1240_v0 = vrot.slane %v608_v60, %v1976_v32  ;;  %459 = vadd.xlane.f32.xlu1 %v458_v56  ;;  %v135_v56 = vld [vmem:[%s2627_s0 + $0x3c8] sm:$0xff]  ;;  %v2187_v60 = vsub.s32 %v854_v47, %v1959_v20  ;;  %v284_v62 = vsel %vm142_vm0, %v61_v55, 0.0 }
  0xc4   :  { %v1236_v1 = vrot.slane %v607_v61, %v1972_v28  ;;  %414 = vadd.xlane.f32.xlu0 %v413_v57  ;;  %v211_v3 = vpop.xlane.xlu1 %210  ;;  %v506_v63 = vsel %vm142_vm0, %v135_v56, 0.0 }
  0xc5   :  { %v163_v4 = vpop.xlane.xlu0 %162  ;;  %v549_v9 = vmul.f32 0.015625, %v211_v3 }
  0xc6   :  { %v1241_v8 = vsel %vm817_vm1, %v1240_v0, %v1236_v1  ;;  %v533_v11 = vmul.f32 0.015625, %v163_v4  ;;  %v91_v4 = vld [vmem:[%s2627_s0 + $0x268] sm:$0xff] }
  0xc7   :  { %v949_v14 = vrot.slane %v549_v9, %v2136_v2  ;;  %189 = vadd.xlane.f32.xlu1 %v188_v5  ;;  %v76_v5 = vld [vmem:[%s2627_s0 + $0x1f0] sm:$0xff]  ;;  %v374_v12 = vsel %vm142_vm0, %v91_v4, 0.0 }
  0xc8   :  { %v851_v15 = vrot.slane %v533_v11, %v2136_v2  ;;  %504 = vadd.xlane.f32.xlu0 %v503_v6  ;;  %v301_v16 = vpop.xlane.xlu1 %300  ;;  %v329_v13 = vsel %vm142_vm0, %v76_v5, 0.0 }
  0xc9   :  { %v256_v18 = vpop.xlane.xlu0 %255  ;;  %v950_v22 = vsel %vm852_vm6, %v949_v14, %v945_v46  ;;  %v579_v24 = vmul.f32 0.015625, %v301_v16 }
  0xca   :  { %v853_v23 = vsel %vm852_vm6, %v851_v15, %v846_v30  ;;  %v564_v25 = vmul.f32 0.015625, %v256_v18  ;;  %v371_v30 = vsel %vm142_vm0, %v90_v26, 0.0 }
  0xcb   :  { %v1097_v29 = vrot.slane %v579_v24, %v2045_v35  ;;  %282 = vadd.xlane.f32.xlu1 %v281_v19  ;;  %v121_v19 = vld [vmem:[%s2627_s0 + $0x358] sm:$0xff] }
  0xcc   :  { %v1023_v31 = vrot.slane %v564_v25, %v2084_v10  ;;  %237 = vadd.xlane.f32.xlu0 %v236_v21  ;;  %v391_v33 = vpop.xlane.xlu1 %390  ;;  %v106_v21 = vld [vmem:[%s2627_s0 + $0x2e0] sm:$0xff] }
  0xcd   :  { %v346_v34 = vpop.xlane.xlu0 %345  ;;  %v1098_v37 = vsel %vm838_vm4, %v1097_v29, %v1093_v59  ;;  %v609_v39 = vmul.f32 0.015625, %v391_v33  ;;  %v419_v27 = vsel %vm142_vm0, %v106_v21, 0.0 }
  0xce   :  { %v1024_v38 = vsel %vm845_vm5, %v1023_v31, %v1019_v45  ;;  %v594_v40 = vmul.f32 0.015625, %v346_v34 }
  0xcf   :  { %v1245_v44 = vrot.slane %v609_v39, %v1988_v42  ;;  %372 = vadd.xlane.f32.xlu1 %v371_v30  ;;  %v77_v30 = vld [vmem:[%s2627_s0 + $0x1f8] sm:$0xff] }
  0xd0   :  { %v1171_v46 = vrot.slane %v594_v40, %v2019_v7  ;;  %327 = vadd.xlane.f32.xlu0 %v326_v36  ;;  %v436_v48 = vpop.xlane.xlu1 %435  ;;  %v136_v36 = vld [vmem:[%s2627_s0 + $0x3d0] sm:$0xff]  ;;  %v332_v43 = vsel %vm142_vm0, %v77_v30, 0.0 }
  0xd1   :  { %v433_v45 = vpop.xlane.xlu0 %432  ;;  %v1246_v51 = vsel %vm824_vm2, %v1245_v44, %v1241_v8  ;;  %v624_v53 = vmul.f32 0.015625, %v436_v48  ;;  %v509_v44 = vsel %vm142_vm0, %v136_v36, 0.0 }
  0xd2   :  { %v1172_v52 = vsel %vm831_vm3, %v1171_v46, %v1167_v58  ;;  %v623_v54 = vmul.f32 0.015625, %v433_v45  ;;  %v107_v45 = vld [vmem:[%s2627_s0 + $0x2e8] sm:$0xff] }
  0xd3   :  { %v1319_v57 = vrot.slane %v624_v53, %v1976_v32  ;;  %462 = vadd.xlane.f32.xlu1 %v461_v49  ;;  %v92_v49 = vld [vmem:[%s2627_s0 + $0x270] sm:$0xff] }
  0xd4   :  { %v1315_v59 = vrot.slane %v623_v54, %v1972_v28  ;;  %417 = vadd.xlane.f32.xlu0 %v416_v50  ;;  %v214_v58 = vpop.xlane.xlu1 %213  ;;  %v377_v56 = vsel %vm142_vm0, %v92_v49, 0.0 }
  0xd5   :  { %v166_v61 = vpop.xlane.xlu0 %165  ;;  %v550_v1 = vmul.f32 0.015625, %v214_v58 }
  0xd6   :  { %v1320_v0 = vsel %vm817_vm1, %v1319_v57, %v1315_v59  ;;  %v534_v3 = vmul.f32 0.015625, %v166_v61  ;;  %v137_v61 = vld [vmem:[%s2627_s0 + $0x3d8] sm:$0xff] }
  0xd7   :  { %v954_v6 = vrot.slane %v550_v1, %v2187_v60  ;;  %285 = vadd.xlane.f32.xlu1 %v284_v62  ;;  %v122_v62 = vld [vmem:[%s2627_s0 + $0x360] sm:$0xff]  ;;  %v512_v5 = vsel %vm142_vm0, %v137_v61, 0.0 }
  0xd8   :  { %v858_v8 = vrot.slane %v534_v3, %v2187_v60  ;;  %507 = vadd.xlane.f32.xlu0 %v506_v63  ;;  %v304_v9 = vpop.xlane.xlu1 %303 }
  0xd9   :  { %v259_v11 = vpop.xlane.xlu0 %258  ;;  %v2203_v14 = vsel %vm859_vm7, %v954_v6, %v950_v22  ;;  %v580_v16 = vmul.f32 0.015625, %v304_v9  ;;  %v467_v6 = vsel %vm142_vm0, %v122_v62, 0.0 }
  0xda   :  { %v860_v15 = vsel %vm859_vm7, %v858_v8, %v853_v23  ;;  %v565_v18 = vmul.f32 0.015625, %v259_v11  ;;  %v464_v23 = vsel %vm142_vm0, %v121_v19, 0.0 }
  0xdb   :  { %v1102_v24 = vrot.slane %v580_v16, %v2084_v10  ;;  %375 = vadd.xlane.f32.xlu1 %v374_v12  ;;  %v93_v12 = vld [vmem:[%s2627_s0 + $0x278] sm:$0xff] }
  0xdc   :  { %v1028_v25 = vrot.slane %v565_v18, %v2136_v2  ;;  %330 = vadd.xlane.f32.xlu0 %v329_v13  ;;  %v394_v22 = vpop.xlane.xlu1 %393  ;;  %v380_v21 = vsel %vm142_vm0, %v93_v12, 0.0 }
  0xdd   :  { %v349_v26 = vpop.xlane.xlu0 %348  ;;  %v2217_v29 = vsel %vm845_vm5, %v1102_v24, %v1098_v37  ;;  %v610_v33 = vmul.f32 0.015625, %v394_v22  ;;  %v861_v37 = vadd.s32 4294967232, %v1951_v17 }
  0xde   :  { %v1029_v31 = vsel %vm852_vm6, %v1028_v25, %v1024_v38  ;;  %v595_v34 = vmul.f32 0.015625, %v349_v26 }
  0xdf   :  { %v1250_v39 = vrot.slane %v610_v33, %v2019_v7  ;;  %465 = vadd.xlane.f32.xlu1 %v464_v23  ;;  %v2243_v54 = vsub.s32 %v861_v37, %v1959_v20  ;;  %v138_v23 = vld [vmem:[%s2627_s0 + $0x3e0] sm:$0xff]  ;;  %v868_v33 = vadd.s32 4294967224, %v1951_v17 }
  0xe0   :  { %v1176_v40 = vrot.slane %v595_v34, %v2045_v35  ;;  %420 = vadd.xlane.f32.xlu0 %v419_v27  ;;  %v481_v41 = vpop.xlane.xlu1 %480  ;;  %v123_v27 = vld [vmem:[%s2627_s0 + $0x368] sm:$0xff]  ;;  %v515_v36 = vsel %vm142_vm0, %v138_v23, 0.0 }
  0xe1   :  { %v439_v38 = vpop.xlane.xlu0 %438  ;;  %v2232_v46 = vsel %vm831_vm3, %v1250_v39, %v1246_v51  ;;  %v639_v50 = vmul.f32 0.015625, %v481_v41  ;;  %v470_v39 = vsel %vm142_vm0, %v123_v27, 0.0 }
  0xe2   :  { %v1177_v47 = vsel %vm838_vm4, %v1176_v40, %v1172_v52  ;;  %v625_v48 = vmul.f32 0.015625, %v439_v38  ;;  %v422_v52 = vsel %vm142_vm0, %v107_v45, 0.0 }
  0xe3   :  { %333 = vadd.xlane.f32.xlu1 %v332_v43  ;;  %v1394_v63 = vrot.slane %v639_v50, %v1972_v28  ;;  %v124_v43 = vld [vmem:[%s2627_s0 + $0x370] sm:$0xff] }
  0xe4   :  { %v1324_v53 = vrot.slane %v625_v48, %v1988_v42  ;;  %510 = vadd.xlane.f32.xlu0 %v509_v44  ;;  %v169_v51 = vpop.xlane.xlu1 %168  ;;  %v109_v44 = vld [vmem:[%s2627_s0 + $0x2f8] sm:$0xff]  ;;  %v2309_v48 = vsub.s32 %v868_v33, %v1959_v20 }
  0xe5   :  { %v484_v55 = vpop.xlane.xlu0 %483  ;;  %v535_v59 = vmul.f32 0.015625, %v169_v51 }
  0xe6   :  { %v2248_v57 = vsel %vm824_vm2, %v1324_v53, %v1320_v0  ;;  %v640_v58 = vmul.f32 0.015625, %v484_v55  ;;  %v473_v55 = vsel %vm142_vm0, %v124_v43, 0.0 }
  0xe7   :  { %v865_v1 = vrot.slane %v535_v59, %v2243_v54  ;;  %423 = vadd.xlane.f32.xlu1 %v422_v52  ;;  %v428_v52 = vsel %vm142_vm0, %v109_v44, 0.0 }
  0xe8   :  { %v1398_v3 = vrot.slane %v640_v58, %v1976_v32  ;;  %378 = vadd.xlane.f32.xlu0 %v377_v56  ;;  %v262_v0 = vpop.xlane.xlu1 %261  ;;  %v108_v32 = vld [vmem:[%s2627_s0 + $0x2f0] sm:$0xff]  ;;  %v1640_v56 = vmov 0.0|0.0  }
  0xe9   :  { %v217_v4 = vpop.xlane.xlu0 %216  ;;  %v2262_v8 = vsel %vm866_vm8, %v865_v1, %v860_v15  ;;  %v566_v11 = vmul.f32 0.015625, %v262_v0  ;;  %v425_v19 = vsel %vm142_vm0, %v108_v32, 0.0  ;;  %1613 = vmatprep.subr.bf16.mxu0 %v1640_v56  ;;  %v139_v1 = vld [vmem:[%s2627_s0 + $0x3e8] sm:$0xff] }
  0xea   :  { %v2265_v9 = vsel %vm817_vm1, %v1398_v3, %v1394_v63  ;;  %v551_v28 = vmul.f32 0.015625, %v217_v4  ;;  %v125_v63 = vld [vmem:[%s2627_s0 + $0x378] sm:$0xff]  ;;  %vm1470_vm1 = vcmask 1041409  }
  0xeb   :  { %v1033_v13 = vrot.slane %v566_v11, %v2187_v60  ;;  %513 = vadd.xlane.f32.xlu1 %v512_v5  ;;  %v476_v11 = vsel %vm142_vm0, %v125_v63, 0.0 }
  0xec   :  { %v959_v16 = vrot.slane %v551_v28, %v2243_v54  ;;  %468 = vadd.xlane.f32.xlu0 %v467_v6  ;;  %v352_v15 = vpop.xlane.xlu1 %351  ;;  %v518_v28 = vsel %vm142_vm0, %v139_v1, 0.0 }
  0xed   :  { %v307_v18 = vpop.xlane.xlu0 %306  ;;  %v2278_v24 = vsel %vm859_vm7, %v1033_v13, %v1029_v31  ;;  %v596_v22 = vmul.f32 0.015625, %v352_v15  ;;  %v141_v15 = vld [vmem:[%s2627_s0 + $0x3f8] sm:$0xff] }
  0xee   :  { %v2282_v25 = vsel %vm866_vm8, %v959_v16, %v2203_v14  ;;  %v581_v26 = vmul.f32 0.015625, %v307_v18  ;;  %v524_v27 = vsel %vm142_vm0, %v141_v15, 0.0 }
  0xef   :  { %v1181_v34 = vrot.slane %v596_v22, %v2084_v10  ;;  %426 = vadd.xlane.f32.xlu1 %v425_v19 }
  0xf0   :  { %v1107_v31 = vrot.slane %v581_v26, %v2136_v2  ;;  %381 = vadd.xlane.f32.xlu0 %v380_v21  ;;  %v442_v14 = vpop.xlane.xlu1 %441 }
  0xf1   :  { %v397_v30 = vpop.xlane.xlu0 %396  ;;  %v2296_v40 = vsel %vm845_vm5, %v1181_v34, %v1177_v47  ;;  %v626_v41 = vmul.f32 0.015625, %v442_v14  ;;  %v655_v47 = vld [vmem:[%s2628_s1] sm:$0xff] }
  0xf2   :  { %v2300_v37 = vsel %vm852_vm6, %v1107_v31, %v2217_v29  ;;  %v611_v38 = vmul.f32 0.015625, %v397_v30  ;;  %v656_v29 = vld [vmem:[%s2628_s1 + $0x8] sm:$0xff]  ;;  %v661_v30 = vld [vmem:[%s2628_s1 + $0x30] sm:$0xff] }
  0xf3   :  { %v1329_v45 = vrot.slane %v626_v41, %v2019_v7  ;;  %516 = vadd.xlane.f32.xlu1 %v515_v36  ;;  %v1614_v50 = vpack.c.bf16 %v656_v29, %v655_v47  ;;  %v662_v36 = vld [vmem:[%s2628_s1 + $0x38] sm:$0xff] }
  0xf4   :  { %v1255_v49 = vrot.slane %v611_v38, %v2045_v35  ;;  %471 = vadd.xlane.f32.xlu0 %v470_v39  ;;  %v172_v53 = vpop.xlane.xlu1 %171  ;;  %v1623_v41 = vpack.c.bf16 %v662_v36, %v661_v30 }
  0xf5   :  { %v487_v51 = vpop.xlane.xlu0 %486  ;;  %v2324_v59 = vsel %vm831_vm3, %v1329_v45, %v2248_v57  ;;  %v536_v61 = vmul.f32 0.015625, %v172_v53  ;;  %1615 = vmatpush3.bf16.msra.mxu0 %v1614_v50  ;;  %v657_v57 = vld [vmem:[%s2628_s1 + $0x10] sm:$0xff]  ;;  %v664_v50 = vld [vmem:[%s2628_s1 + $0x48] sm:$0xff] }
  0xf6   :  { %v2328_v58 = vsel %vm838_vm4, %v1255_v49, %v2232_v46  ;;  %v641_v62 = vmul.f32 0.015625, %v487_v51  ;;  %1616 = vmatprep.subr.bf16.mxu0 %v1640_v56  ;;  %v658_v46 = vld [vmem:[%s2628_s1 + $0x18] sm:$0xff]  ;;  %v663_v49 = vld [vmem:[%s2628_s1 + $0x40] sm:$0xff] }
  0xf7   :  { %v872_v3 = vrot.slane %v536_v61, %v2309_v48  ;;  %474 = vadd.xlane.f32.xlu1 %v473_v55  ;;  %v1617_v4 = vpack.c.bf16 %v658_v46, %v657_v57  ;;  %v665_v57 = vld [vmem:[%s2628_s1 + $0x50] sm:$0xff]  ;;  %v666_v46 = vld [vmem:[%s2628_s1 + $0x58] sm:$0xff] }
  0xf8   :  { %v1403_v0 = vrot.slane %v641_v62, %v1988_v42  ;;  %429 = vadd.xlane.f32.xlu0 %v428_v52  ;;  %v265_v5 = vpop.xlane.xlu1 %264  ;;  %v140_v42 = vld [vmem:[%s2627_s0 + $0x3f0] sm:$0xff] }
  0xf9   :  { %v220_v6 = vpop.xlane.xlu0 %219  ;;  %v2349_v32 = vsel %vm873_vm9, %v872_v3, %v2262_v8  ;;  %v567_v13 = vmul.f32 0.015625, %v265_v5  ;;  %1618 = vmatpush3.bf16.msra.mxu0 %v1617_v4  ;;  %v659_v8 = vld [vmem:[%s2628_s1 + $0x20] sm:$0xff]  ;;  %v521_v23 = vsel %vm142_vm0, %v140_v42, 0.0  ;;  %vm915_vm0 = vcmask 1048512  }
  0xfa   :  { %v2353_v12 = vsel %vm824_vm2, %v1403_v0, %v2265_v9  ;;  %v552_v16 = vmul.f32 0.015625, %v220_v6  ;;  %1619 = vmatprep.subr.bf16.mxu0 %v1640_v56  ;;  %v660_v9 = vld [vmem:[%s2628_s1 + $0x28] sm:$0xff]  ;;  %v1629_v0 = vpack.c.bf16 %v666_v46, %v665_v57  ;;  %vm1472_vm2 = vcmask 1042434  }
  0xfb   :  { %v1038_v18 = vrot.slane %v567_v13, %v2243_v54  ;;  %477 = vadd.xlane.f32.xlu1 %v476_v11  ;;  %v1620_v21 = vpack.c.bf16 %v660_v9, %v659_v8  ;;  %v667_v13 = vld [vmem:[%s2628_s1 + $0x60] sm:$0xff] }
  0xfc   :  { %v964_v19 = vrot.slane %v552_v16, %v2309_v48  ;;  %519 = vadd.xlane.f32.xlu0 %v518_v28  ;;  %v355_v22 = vpop.xlane.xlu1 %354 }
  0xfd   :  { %v310_v26 = vpop.xlane.xlu0 %309  ;;  %v1039_v33 = vsel %vm866_vm8, %v1038_v18, %v2278_v24  ;;  %v597_v31 = vmul.f32 0.015625, %v355_v22  ;;  %1621 = vmatpush3.bf16.msra.mxu0 %v1620_v21  ;;  %v882_v21 = vadd.s32 4294967208, %v1951_v17  ;;  %v669_v22 = vld [vmem:[%s2628_s1 + $0x70] sm:$0xff] }
  0xfe   :  { %v965_v34 = vsel %vm873_vm9, %v964_v19, %v2282_v25  ;;  %v582_v14 = vmul.f32 0.015625, %v310_v26  ;;  %1622 = vmatprep.subr.bf16.mxu0 %v1640_v56  ;;  %v875_v25 = vadd.s32 4294967216, %v1951_v17  ;;  %v670_v26 = vld [vmem:[%s2628_s1 + $0x78] sm:$0xff] }
  0xff   :  { %v1186_v39 = vrot.slane %v597_v31, %v2136_v2  ;;  %525 = vadd.xlane.f32.xlu1 %v524_v27 }
 0x100   :  { %v1112_v24 = vrot.slane %v582_v14, %v2187_v60  ;;  %522 = vadd.xlane.f32.xlu0 %v521_v23  ;;  %v445_v38 = vpop.xlane.xlu1 %444  ;;  %v2400_v51 = vsub.s32 %v875_v25, %v1959_v20 }
 0x101   :  { %v400_v43 = vpop.xlane.xlu0 %399  ;;  %v1187_v44 = vsel %vm852_vm6, %v1186_v39, %v2296_v40  ;;  %v627_v29 = vmul.f32 0.015625, %v445_v38  ;;  %1624 = vmatpush3.bf16.msra.mxu0 %v1623_v41  ;;  %v1642_v39 = vmov 0.0   ;;  %v2445_v41 = vsub.s32 %v882_v21, %v1959_v20 }
 0x102   :  { %v1113_v47 = vsel %vm859_vm7, %v1112_v24, %v2300_v37  ;;  %v612_v45 = vmul.f32 0.015625, %v400_v43  ;;  %1625 = vmatprep.subr.bf16.mxu0 %v1640_v56  ;;  %v1626_v37 = vpack.c.bf16 %v664_v50, %v663_v49  ;;  %1610 = vmatprep.mubr.msk.f32.mxu0 %vm1641_vm11, %v1642_v39 }
 0x103   :  { %v1334_v53 = vrot.slane %v627_v29, %v2045_v35 }
 0x104   :  { %v1260_v40 = vrot.slane %v612_v45, %v2084_v10  ;;  %v175_v55 = vpop.xlane.xlu1 %174 }
 0x105   :  { %v490_v52 = vpop.xlane.xlu0 %489  ;;  %v1335_v61 = vsel %vm838_vm4, %v1334_v53, %v2324_v59  ;;  %v537_v63 = vmul.f32 0.015625, %v175_v55  ;;  %1627 = vmatpush3.bf16.msra.mxu0 %v1626_v37 }
 0x106   :  { %v1261_v62 = vsel %vm845_vm5, %v1260_v40, %v2328_v58  ;;  %v642_v1 = vmul.f32 0.015625, %v490_v52  ;;  %1628 = vmatprep.subr.bf16.mxu0 %v1640_v56 }
 0x107   :  { %v879_v3 = vrot.slane %v537_v63, %v2400_v51 }
 0x108   :  { %v1408_v59 = vrot.slane %v642_v1, %v2019_v7  ;;  %v268_v58 = vpop.xlane.xlu1 %267  ;;  %v668_v7 = vld [vmem:[%s2628_s1 + $0x68] sm:$0xff] }
 0x109   :  { %v223_v4 = vpop.xlane.xlu0 %222  ;;  %v881_v5 = vsel %vm880_vm10, %v879_v3, %v2349_v32  ;;  %v568_v11 = vmul.f32 0.015625, %v268_v58  ;;  %1630 = vmatpush3.bf16.msra.mxu0 %v1629_v0  ;;  %v1632_v42 = vpack.c.bf16 %v668_v7, %v667_v13 }
 0x10a   :  { %v1409_v6 = vsel %vm831_vm3, %v1408_v59, %v2353_v12  ;;  %v553_v28 = vmul.f32 0.015625, %v223_v4  ;;  %1631 = vmatprep.subr.bf16.mxu0 %v1640_v56  ;;  %v889_v4 = vadd.s32 4294967200, %v1951_v17  ;;  %vm1474_vm3 = vcmask 1043459  }
 0x10b   :  { %v1043_v16 = vrot.slane %v568_v11, %v2309_v48 }
 0x10c   :  { %v969_v32 = vrot.slane %v553_v28, %v2400_v51  ;;  %v358_v15 = vpop.xlane.xlu1 %357 }
 0x10d   :  { %v313_v12 = vpop.xlane.xlu0 %312  ;;  %v1044_v8 = vsel %vm873_vm9, %v1043_v16, %v1039_v33  ;;  %v598_v18 = vmul.f32 0.015625, %v358_v15  ;;  %1633 = vmatpush3.bf16.msra.mxu0 %v1632_v42  ;;  %v1635_v33 = vpack.c.bf16 %v670_v26, %v669_v22  ;;  %v2465_v42 = vsub.s32 %v889_v4, %v1959_v20 }
 0x10e   :  { %v970_v9 = vsel %vm880_vm10, %v969_v32, %v965_v34  ;;  %v583_v19 = vmul.f32 0.015625, %v313_v12  ;;  %1634 = vmatprep.subr.bf16.mxu0 %v1640_v56 }
 0x10f   :  { %v1191_v23 = vrot.slane %v598_v18, %v2187_v60 }
 0x110   :  { %v1117_v27 = vrot.slane %v583_v19, %v2243_v54  ;;  %v448_v34 = vpop.xlane.xlu1 %447 }
 0x111   :  { %v403_v31 = vpop.xlane.xlu0 %402  ;;  %v1192_v14 = vsel %vm859_vm7, %v1191_v23, %v1187_v44  ;;  %v628_v56 = vmul.f32 0.015625, %v448_v34  ;;  %1636 = vmatpush3.bf16.msra.mxu0 %v1635_v33 }
 0x112   :  { %v1118_v30 = vsel %vm866_vm8, %v1117_v27, %v1113_v47  ;;  %v613_v36 = vmul.f32 0.015625, %v403_v31 }
 0x113   :  { %v1339_v24 = vrot.slane %v628_v56, %v2084_v10 }
 0x114   :  { %v1265_v25 = vrot.slane %v613_v36, %v2136_v2  ;;  %v178_v38 = vpop.xlane.xlu1 %177 }
 0x115   :  { %v493_v43 = vpop.xlane.xlu0 %492  ;;  %v1340_v29 = vsel %vm845_vm5, %v1339_v24, %v1335_v61  ;;  %v538_v47 = vmul.f32 0.015625, %v178_v38 }
 0x116   :  { %v1266_v44 = vsel %vm852_vm6, %v1265_v25, %v1261_v62  ;;  %v643_v45 = vmul.f32 0.015625, %v493_v43 }
 0x117   :  { %v886_v49 = vrot.slane %v538_v47, %v2445_v41 }
 0x118   :  { %v1413_v50 = vrot.slane %v643_v45, %v2045_v35  ;;  %v271_v53 = vpop.xlane.xlu1 %270 }
 0x119   :  { %v226_v40 = vpop.xlane.xlu0 %225  ;;  %v888_v37 = vsel %vm887_vm12, %v886_v49, %v881_v5  ;;  %v569_v52 = vmul.f32 0.015625, %v271_v53 }
 0x11a   :  { %v1414_v55 = vsel %vm838_vm4, %v1413_v50, %v1409_v6  ;;  %v554_v63 = vmul.f32 0.015625, %v226_v40  ;;  %vm1476_vm4 = vcmask 1044484  }
 0x11b   :  { %v1048_v1 = vrot.slane %v569_v52, %v2400_v51 }
 0x11c   :  { %v974_v61 = vrot.slane %v554_v63, %v2445_v41  ;;  %v361_v62 = vpop.xlane.xlu1 %360 }
 0x11d   :  { %v316_v57 = vpop.xlane.xlu0 %315  ;;  %v1049_v46 = vsel %vm880_vm10, %v1048_v1, %v1044_v8  ;;  %v599_v59 = vmul.f32 0.015625, %v361_v62 }
 0x11e   :  { %v975_v3 = vsel %vm887_vm12, %v974_v61, %v970_v9  ;;  %v584_v35 = vmul.f32 0.015625, %v316_v57 }
 0x11f   :  { %v1196_v0 = vrot.slane %v599_v59, %v2243_v54 }
 0x120   :  { %v1122_v58 = vrot.slane %v584_v35, %v2309_v48  ;;  %v451_v5 = vpop.xlane.xlu1 %450 }
 0x121   :  { %v406_v6 = vpop.xlane.xlu0 %405  ;;  %v1197_v11 = vsel %vm866_vm8, %v1196_v0, %v1192_v14  ;;  %v629_v13 = vmul.f32 0.015625, %v451_v5 }
 0x122   :  { %v1123_v28 = vsel %vm873_vm9, %v1122_v58, %v1118_v30  ;;  %v614_v7 = vmul.f32 0.015625, %v406_v6 }
 0x123   :  { %v1344_v16 = vrot.slane %v629_v13, %v2136_v2 }
 0x124   :  { %v1270_v32 = vrot.slane %v614_v7, %v2187_v60  ;;  %v181_v15 = vpop.xlane.xlu1 %180 }
 0x125   :  { %v496_v12 = vpop.xlane.xlu0 %495  ;;  %v1345_v8 = vsel %vm852_vm6, %v1344_v16, %v1340_v29  ;;  %v539_v18 = vmul.f32 0.015625, %v181_v15  ;;  %v896_v29 = vadd.s32 4294967192, %v1951_v17 }
 0x126   :  { %v1271_v9 = vsel %vm859_vm7, %v1270_v32, %v1266_v44  ;;  %v644_v19 = vmul.f32 0.015625, %v496_v12 }
 0x127   :  { %v893_v21 = vrot.slane %v539_v18, %v2465_v42 }
 0x128   :  { %v1418_v22 = vrot.slane %v644_v19, %v2084_v10  ;;  %v274_v26 = vpop.xlane.xlu1 %273 }
 0x129   :  { %v229_v23 = vpop.xlane.xlu0 %228  ;;  %v895_v27 = vsel %vm894_vm13, %v893_v21, %v888_v37  ;;  %v570_v34 = vmul.f32 0.015625, %v274_v26 }
 0x12a   :  { %v1419_v33 = vsel %vm845_vm5, %v1418_v22, %v1414_v55  ;;  %v555_v31 = vmul.f32 0.015625, %v229_v23  ;;  %v2485_v55 = vsub.s32 %v896_v29, %v1959_v20  ;;  %vm1478_vm5 = vcmask 1045509  }
 0x12b   :  { %v1053_v14 = vrot.slane %v570_v34, %v2445_v41 }
 0x12c   :  { %v979_v30 = vrot.slane %v555_v31, %v2465_v42  ;;  %v364_v56 = vpop.xlane.xlu1 %363 }
 0x12d   :  { %v319_v36 = vpop.xlane.xlu0 %318  ;;  %v1054_v39 = vsel %vm887_vm12, %v1053_v14, %v1049_v46  ;;  %v600_v25 = vmul.f32 0.015625, %v364_v56 }
 0x12e   :  { %v980_v24 = vsel %vm894_vm13, %v979_v30, %v975_v3  ;;  %v585_v10 = vmul.f32 0.015625, %v319_v36 }
 0x12f   :  { %v1201_v38 = vrot.slane %v600_v25, %v2309_v48 }
 0x130   :  { %v1127_v43 = vrot.slane %v585_v10, %v2400_v51  ;;  %v454_v44 = vpop.xlane.xlu1 %453 }
 0x131   :  { %v409_v47 = vpop.xlane.xlu0 %408  ;;  %v1202_v45 = vsel %vm873_vm9, %v1201_v38, %v1197_v11  ;;  %v630_v50 = vmul.f32 0.015625, %v454_v44 }
 0x132   :  { %v1128_v49 = vsel %vm880_vm10, %v1127_v43, %v1123_v28  ;;  %v615_v53 = vmul.f32 0.015625, %v409_v47 }
 0x133   :  { %v1349_v40 = vrot.slane %v630_v50, %v2187_v60 }
 0x134   :  { %v1275_v37 = vrot.slane %v615_v53, %v2243_v54  ;;  %v184_v52 = vpop.xlane.xlu1 %183 }
 0x135   :  { %v499_v63 = vpop.xlane.xlu0 %498  ;;  %v1350_v1 = vsel %vm859_vm7, %v1349_v40, %v1345_v8  ;;  %v540_v62 = vmul.f32 0.015625, %v184_v52  ;;  %v903_v8 = vadd.s32 4294967184, %v1951_v17 }
 0x136   :  { %v1276_v61 = vsel %vm866_vm8, %v1275_v37, %v1271_v9  ;;  %v645_v57 = vmul.f32 0.015625, %v499_v63 }
 0x137   :  { %v900_v46 = vrot.slane %v540_v62, %v2485_v55 }
 0x138   :  { %v1423_v3 = vrot.slane %v645_v57, %v2136_v2  ;;  %v277_v59 = vpop.xlane.xlu1 %276 }
 0x139   :  { %v232_v35 = vpop.xlane.xlu0 %231  ;;  %v902_v0 = vsel %vm901_vm14, %v900_v46, %v895_v27  ;;  %v571_v4 = vmul.f32 0.015625, %v277_v59 }
 0x13a   :  { %v1424_v58 = vsel %vm852_vm6, %v1423_v3, %v1419_v33  ;;  %v556_v5 = vmul.f32 0.015625, %v232_v35  ;;  %v2511_v33 = vsub.s32 %v903_v8, %v1959_v20  ;;  %vm1480_vm6 = vcmask 1046534  }
 0x13b   :  { %v1058_v6 = vrot.slane %v571_v4, %v2465_v42 }
 0x13c   :  { %v984_v11 = vrot.slane %v556_v5, %v2485_v55  ;;  %v367_v28 = vpop.xlane.xlu1 %366 }
 0x13d   :  { %v322_v13 = vpop.xlane.xlu0 %321  ;;  %v2496_v7 = vsel %vm894_vm13, %v1058_v6, %v1054_v39  ;;  %v601_v2 = vmul.f32 0.015625, %v367_v28 }
 0x13e   :  { %v985_v16 = vsel %vm901_vm14, %v984_v11, %v980_v24  ;;  %v586_v32 = vmul.f32 0.015625, %v322_v13 }
 0x13f   :  { %v1206_v15 = vrot.slane %v601_v2, %v2400_v51 }
 0x140   :  { %v1132_v12 = vrot.slane %v586_v32, %v2445_v41  ;;  %v457_v9 = vpop.xlane.xlu1 %456 }
 0x141   :  { %v412_v18 = vpop.xlane.xlu0 %411  ;;  %v2503_v19 = vsel %vm880_vm10, %v1206_v15, %v1202_v45  ;;  %v631_v22 = vmul.f32 0.015625, %v457_v9 }
 0x142   :  { %v2506_v21 = vsel %vm887_vm12, %v1132_v12, %v1128_v49  ;;  %v616_v26 = vmul.f32 0.015625, %v412_v18  ;;  %v910_v49 = vadd.s32 4294967176, %v1951_v17 }
 0x143   :  { %v1354_v23 = vrot.slane %v631_v22, %v2243_v54 }
 0x144   :  { %v1280_v27 = vrot.slane %v616_v26, %v2309_v48  ;;  %v187_v34 = vpop.xlane.xlu1 %186 }
 0x145   :  { %v502_v31 = vpop.xlane.xlu0 %501  ;;  %v2514_v14 = vsel %vm866_vm8, %v1354_v23, %v1350_v1  ;;  %v541_v56 = vmul.f32 0.015625, %v187_v34 }
 0x146   :  { %v2517_v30 = vsel %vm873_vm9, %v1280_v27, %v1276_v61  ;;  %v646_v36 = vmul.f32 0.015625, %v502_v31 }
 0x147   :  { %v907_v39 = vrot.slane %v541_v56, %v2511_v33 }
 0x148   :  { %v1428_v24 = vrot.slane %v646_v36, %v2187_v60  ;;  %v280_v25 = vpop.xlane.xlu1 %279  ;;  %v2533_v60 = vsub.s32 %v910_v49, %v1959_v20 }
 0x149   :  { %v235_v10 = vpop.xlane.xlu0 %234  ;;  %v909_v38 = vsel %vm908_vm15, %v907_v39, %v902_v0  ;;  %v572_v0 = vmul.f32 0.015625, %v280_v25 }
 0x14a   :  { %v2523_v43 = vsel %vm859_vm7, %v1428_v24, %v1424_v58  ;;  %v557_v50 = vmul.f32 0.015625, %v235_v10  ;;  %vm1482_vm7 = vcmask 1047559  }
 0x14b   :  { %v1063_v6 = vrot.slane %v572_v0, %v2485_v55 }
 0x14c   :  { %v370_v29 = vpop.xlane.xlu1 %369  ;;  %v989_v52 = vrot.slane %v557_v50, %v2511_v33 }
 0x14d   :  { %v325_v44 = vpop.xlane.xlu0 %324 }
 0x14e   :  { %v990_v17 = vsel %vm908_vm15, %v989_v52, %v985_v16  ;;  %v1064_v16 = vsel %vm901_vm14, %v1063_v6, %v2496_v7  ;;  %v587_v18 = vmul.f32 0.015625, %v325_v44 }
 0x150   :  { %v2525_v47 = vpop.xlane.xlu1 %459  ;;  %v1137_v31 = vrot.slane %v587_v18, %v2465_v42 }
 0x151   :  { %v2527_v45 = vpop.xlane.xlu0 %414 }
 0x152   :  { %v1138_v25 = vsel %vm894_vm13, %v1137_v31, %v2506_v21 }
 0x154   :  { %v190_v53 = vpop.xlane.xlu1 %189 }
 0x155   :  { %v2530_v40 = vpop.xlane.xlu0 %504  ;;  %v542_v37 = vmul.f32 0.015625, %v190_v53  ;;  %v602_v53 = vmul.f32 0.015625, %v370_v29 }
 0x157   :  { %v914_v61 = vrot.slane %v542_v37, %v2533_v60  ;;  %v1211_v21 = vrot.slane %v602_v53, %v2445_v41 }
 0x158   :  { %v283_v63 = vpop.xlane.xlu1 %282 }
 0x159   :  { %v238_v1 = vpop.xlane.xlu0 %237  ;;  %v916_v59 = vsel %vm915_vm0, %v914_v61, %v909_v38  ;;  %v573_v58 = vmul.f32 0.015625, %v283_v63 }
 0x15a   :  { %v558_v62 = vmul.f32 0.015625, %v238_v1 }
 0x15b   :  { %v1068_v11 = vrot.slane %v573_v58, %v2511_v33 }
 0x15c   :  { %v994_v57 = vrot.slane %v558_v62, %v2533_v60  ;;  %v373_v46 = vpop.xlane.xlu1 %372 }
 0x15d   :  { %v328_v3 = vpop.xlane.xlu0 %327  ;;  %v1069_v15 = vsel %vm908_vm15, %v1068_v11, %v1064_v16  ;;  %v603_v52 = vmul.f32 0.015625, %v373_v46  ;;  %v1212_v46 = vsel %vm887_vm12, %v1211_v21, %v2503_v19 }
 0x15e   :  { %v995_v20 = vsel %vm915_vm0, %v994_v57, %v990_v17  ;;  %v588_v26 = vmul.f32 0.015625, %v328_v3  ;;  %v632_v17 = vmul.f32 0.015625, %v2525_v47 }
 0x15f   :  { %v1471_v35 = vsel %vm1470_vm1, %v995_v20, %v916_v59  ;;  %v1216_v3 = vrot.slane %v603_v52, %v2465_v42  ;;  %v617_v59 = vmul.f32 0.015625, %v2527_v45 }
 0x160   :  { %v463_v4 = vpop.xlane.xlu1 %462  ;;  %v1142_v56 = vrot.slane %v588_v26, %v2485_v55  ;;  %v1359_v11 = vrot.slane %v632_v17, %v2309_v48 }
 0x161   :  { %v418_v5 = vpop.xlane.xlu0 %417  ;;  %v1217_v47 = vsel %vm894_vm13, %v1216_v3, %v1212_v46  ;;  %v1285_v45 = vrot.slane %v617_v59, %v2400_v51 }
 0x162   :  { %v1143_v10 = vsel %vm901_vm14, %v1142_v56, %v1138_v25  ;;  %v618_v58 = vmul.f32 0.015625, %v418_v5 }
 0x164   :  { %v286_v28 = vpop.xlane.xlu1 %285 }
 0x165   :  { %v2543_v13 = vpop.xlane.xlu0 %507  ;;  %v574_v2 = vmul.f32 0.015625, %v286_v28  ;;  %v633_v28 = vmul.f32 0.015625, %v463_v4 }
 0x167   :  { %v1073_v32 = vrot.slane %v574_v2, %v2533_v60  ;;  %v1364_v26 = vrot.slane %v633_v28, %v2400_v51 }
 0x168   :  { %v376_v12 = vpop.xlane.xlu1 %375 }
 0x169   :  { %v331_v8 = vpop.xlane.xlu0 %330  ;;  %v1074_v9 = vsel %vm915_vm0, %v1073_v32, %v1069_v15  ;;  %v604_v1 = vmul.f32 0.015625, %v376_v12  ;;  %v647_v12 = vmul.f32 0.015625, %v2530_v40  ;;  %v1360_v40 = vsel %vm873_vm9, %v1359_v11, %v2514_v14 }
 0x16a   :  { %v1473_v22 = vsel %vm1472_vm2, %v1074_v9, %v1471_v35  ;;  %v589_v23 = vmul.f32 0.015625, %v331_v8 }
 0x16b   :  { %v1221_v20 = vrot.slane %v604_v1, %v2485_v55 }
 0x16c   :  { %v466_v27 = vpop.xlane.xlu1 %465  ;;  %v1147_v7 = vrot.slane %v589_v23, %v2511_v33 }
 0x16d   :  { %v421_v34 = vpop.xlane.xlu0 %420  ;;  %v1222_v16 = vsel %vm901_vm14, %v1221_v20, %v1217_v47  ;;  %v634_v8 = vmul.f32 0.015625, %v466_v27  ;;  %v1286_v27 = vsel %vm880_vm10, %v1285_v45, %v2517_v30  ;;  %v1365_v30 = vsel %vm880_vm10, %v1364_v26, %v1360_v40 }
 0x16e   :  { %v1148_v44 = vsel %vm908_vm15, %v1147_v7, %v1143_v10  ;;  %v619_v2 = vmul.f32 0.015625, %v421_v34 }
 0x16f   :  { %v1369_v25 = vrot.slane %v634_v8, %v2445_v41 }
 0x170   :  { %v334_v36 = vpop.xlane.xlu1 %333  ;;  %v1295_v23 = vrot.slane %v619_v2, %v2465_v42 }
 0x171   :  { %v511_v39 = vpop.xlane.xlu0 %510  ;;  %v590_v24 = vmul.f32 0.015625, %v334_v36  ;;  %v1433_v36 = vrot.slane %v647_v12, %v2243_v54 }
 0x173   :  { %v1152_v38 = vrot.slane %v590_v24, %v2533_v60  ;;  %v648_v24 = vmul.f32 0.015625, %v2543_v13 }
 0x174   :  { %v424_v49 = vpop.xlane.xlu1 %423 }
 0x175   :  { %v379_v50 = vpop.xlane.xlu0 %378  ;;  %v1153_v37 = vsel %vm915_vm0, %v1152_v38, %v1148_v44  ;;  %v620_v32 = vmul.f32 0.015625, %v424_v49 }
 0x176   :  { %v1475_v63 = vsel %vm1474_vm3, %v1153_v37, %v1473_v22  ;;  %v605_v61 = vmul.f32 0.015625, %v379_v50  ;;  %v1290_v22 = vrot.slane %v618_v58, %v2445_v41  ;;  %v649_v50 = vmul.f32 0.015625, %v511_v39 }
 0x177   :  { %v1300_v56 = vrot.slane %v620_v32, %v2485_v55  ;;  %v1370_v39 = vsel %vm887_vm12, %v1369_v25, %v1365_v30  ;;  %v1434_v58 = vsel %vm866_vm8, %v1433_v36, %v2523_v43 }
 0x178   :  { %v514_v62 = vpop.xlane.xlu1 %513  ;;  %v1226_v29 = vrot.slane %v605_v61, %v2511_v33  ;;  %v1291_v49 = vsel %vm887_vm12, %v1290_v22, %v1286_v27 }
 0x179   :  { %v469_v57 = vpop.xlane.xlu0 %468  ;;  %v1296_v37 = vsel %vm894_vm13, %v1295_v23, %v1291_v49  ;;  %v650_v52 = vmul.f32 0.015625, %v514_v62  ;;  %v1443_v62 = vrot.slane %v649_v50, %v2400_v51 }
 0x17a   :  { %v1227_v19 = vsel %vm908_vm15, %v1226_v29, %v1222_v16  ;;  %v635_v34 = vmul.f32 0.015625, %v469_v57  ;;  %v1301_v13 = vsel %vm901_vm14, %v1300_v56, %v1296_v37  ;;  %v1438_v57 = vrot.slane %v648_v24, %v2309_v48 }
 0x17c   :  { %v427_v35 = vpop.xlane.xlu1 %426  ;;  %v1374_v54 = vrot.slane %v635_v34, %v2465_v42  ;;  %v1439_v47 = vsel %vm873_vm9, %v1438_v57, %v1434_v58 }
 0x17d   :  { %v382_v0 = vpop.xlane.xlu0 %381  ;;  %v621_v5 = vmul.f32 0.015625, %v427_v35  ;;  %v1444_v16 = vsel %vm880_vm10, %v1443_v62, %v1439_v47 }
 0x17e   :  { %v606_v6 = vmul.f32 0.015625, %v382_v0  ;;  %v1448_v0 = vrot.slane %v650_v52, %v2445_v41  ;;  %v1375_v46 = vsel %vm894_vm13, %v1374_v54, %v1370_v39 }
 0x17f   :  { %v1305_v10 = vrot.slane %v621_v5, %v2511_v33 }
 0x180   :  { %v1231_v15 = vrot.slane %v606_v6, %v2533_v60  ;;  %v517_v9 = vpop.xlane.xlu1 %516 }
 0x181   :  { %v472_v18 = vpop.xlane.xlu0 %471  ;;  %v1306_v21 = vsel %vm908_vm15, %v1305_v10, %v1301_v13 }
 0x182   :  { %v1232_v4 = vsel %vm915_vm0, %v1231_v15, %v1227_v19  ;;  %v636_v7 = vmul.f32 0.015625, %v472_v18 }
 0x183   :  { %v1477_v31 = vsel %vm1476_vm4, %v1232_v4, %v1475_v63  ;;  %v651_v63 = vmul.f32 0.015625, %v517_v9  ;;  %v1560_v4 = vld [vmem:[%s2629_s2] ss:$0 sm:$0xff] }
 0x184   :  { %v475_v38 = vpop.xlane.xlu1 %474  ;;  %v1379_v1 = vrot.slane %v636_v7, %v2485_v55 }
 0x185   :  { %v430_v44 = vpop.xlane.xlu0 %429  ;;  %v637_v14 = vmul.f32 0.015625, %v475_v38  ;;  %v1453_v6 = vrot.slane %v651_v63, %v2465_v42  ;;  %v1449_v42 = vsel %vm887_vm12, %v1448_v0, %v1444_v16 }
 0x186   :  { %v622_v53 = vmul.f32 0.015625, %v430_v44  ;;  %v1380_v11 = vsel %vm901_vm14, %v1379_v1, %v1375_v46 }
 0x187   :  { %v1384_v17 = vrot.slane %v637_v14, %v2511_v33  ;;  %v1454_v8 = vsel %vm894_vm13, %v1453_v6, %v1449_v42 }
 0x188   :  { %v1310_v61 = vrot.slane %v622_v53, %v2533_v60  ;;  %v478_v3 = vpop.xlane.xlu1 %477 }
 0x189   :  { %v520_v59 = vpop.xlane.xlu0 %519  ;;  %v638_v29 = vmul.f32 0.015625, %v478_v3  ;;  %v1385_v28 = vsel %vm908_vm15, %v1384_v17, %v1380_v11 }
 0x18a   :  { %v1311_v20 = vsel %vm915_vm0, %v1310_v61, %v1306_v21  ;;  %v652_v35 = vmul.f32 0.015625, %v520_v59 }
 0x18b   :  { %v1479_v48 = vsel %vm1478_vm5, %v1311_v20, %v1477_v31  ;;  %v1389_v51 = vrot.slane %v638_v29, %v2533_v60 }
 0x18c   :  { %v1458_v41 = vrot.slane %v652_v35, %v2485_v55  ;;  %v526_v45 = vpop.xlane.xlu1 %525 }
 0x18d   :  { %v523_v2 = vpop.xlane.xlu0 %522  ;;  %v654_v15 = vmul.f32 0.015625, %v526_v45  ;;  %v1390_v43 = vsel %vm915_vm0, %v1389_v51, %v1385_v28 }
 0x18e   :  { %v653_v32 = vmul.f32 0.015625, %v523_v2  ;;  %v1481_v12 = vsel %vm1480_vm6, %v1390_v43, %v1479_v48  ;;  %v1459_v9 = vsel %vm901_vm14, %v1458_v41, %v1454_v8 }
 0x18f   :  { %v1468_v5 = vrot.slane %v654_v15, %v2533_v60 }
 0x190   :  { %v1463_v19 = vrot.slane %v653_v32, %v2511_v33 }
 0x192   :  { %v1464_v55 = vsel %vm908_vm15, %v1463_v19, %v1459_v9 }
 0x193   :  { %v1469_v18 = vsel %vm915_vm0, %v1468_v5, %v1464_v55 }
 0x194   :  { %v1483_v22 = vsel %vm1482_vm7, %v1469_v18, %v1481_v12 }
 0x195   :  { %1611 = vmatmul.mubr.f32.vlgmr.msra.gmra.mrb[0].mxu0 %v1483_v22 }
 0x268   :  { %v1551_v26 = vpop.f32.mrb[0].mxu0 }
 0x269   :  { %v1552_v23 = vadd.f32 %v1560_v4, %v1551_v26  ;;  %v1612_v34 = vpop.f32.mrb[1].mxu0 }
 0x26b   :  { %1555 = vst [vmem:[%s2630_s3] sm:$0xff] %v1552_v23 }

</bundles_post_ra>
